<compile_context>
chip_gen: v7x
topology: tpu7x:2x2x1
jax: 0.10.0
libtpu: 0.0.40
codegen_flags: <defaults>
</compile_context>

<pallas_src>
import math

import jax
import jax.numpy as jnp
from jax.experimental import pallas as pl
from jax.experimental.pallas import tpu as pltpu


def ged_matrix_kernel(e1_ref, wflat_ref, e2t_ref, w1_ref, b1_ref,
                      w2_ref, b2_ref, w3_ref, b3_ref, out_ref, t_scr):
    tm = e1_ref.shape[0]
    d, tn = e2t_ref.shape
    k = w2_ref.shape[0]

    # ---- Stage 1a (hoisted over the n2-tile axis): fused lane-dense matmul ----
    #   t_all[i, a*d + e] = sum_dd e1[i, dd] * wm[a, dd, e]
    @pl.when(pl.program_id(1) == 0)
    def _():
        t_scr[...] = jnp.dot(e1_ref[...], wflat_ref[...],
                             preferred_element_type=jnp.float32)

    e2t = e2t_ref[...]                                    # (d, tn), pre-transposed

    # ---- Stage 1b: per-channel contraction against the shared lane-dense RHS ----
    # k is small and static, so a short unrolled loop of (tm,d)@(d,tn) matmuls.
    # TODO(synk): switch to lax.fori_loop(..., unroll=True) if k grows large.
    slices = []
    for a in range(k):
        lhs = t_scr[:, a * d:(a + 1) * d].astype(e2t.dtype)
        slices.append(jnp.dot(lhs, e2t, preferred_element_type=jnp.float32))

    # Channels-first feature matrix (k, tm*tn): spatial stays on the lane axis,
    # so every MLP operand below is lane-dense (this is the single relayout).
    feats = jnp.stack(slices, axis=0).reshape(k, tm * tn)

    # ---- Stage 2: MLP k -> 2k -> k -> 1, channels-first, no transposes ----
    h1 = jnp.dot(w1_ref[...], feats, preferred_element_type=jnp.float32) + b1_ref[...]
    h1 = jnp.maximum(h1, 0.0)                             # (2k, tm*tn)
    h2 = jnp.dot(w2_ref[...], h1, preferred_element_type=jnp.float32) + b2_ref[...]
    h2 = jnp.maximum(h2, 0.0)                             # (k, tm*tn)
    o = jnp.dot(w3_ref[...], h2, preferred_element_type=jnp.float32) + b3_ref[...]
    out_ref[...] = o.reshape(tm, tn).astype(out_ref.dtype)  # lane-dense output tile


def _round_up(x, m):
    return (x + m - 1) // m * m


def ged_matrix_forward(e1, e2, wm, w1, b1, w2, b2, w3, b3,
                       *, tile_m=None, tile_n=None,
                       bilinear_dtype=jnp.float32):
    """Pallas forward of GedMatrixModule.

    e1: (n1, d), e2: (n2, d), wm: (k, d, d),
    w1/b1: (2k, k)/(2k,), w2/b2: (k, 2k)/(k,), w3/b3: (1, k)/(1,).
    Returns (n1, n2) float32.

    bilinear_dtype=jnp.bfloat16 runs the bilinear stage on the bf16 MXU
    (f32 accumulation) on v6e/v7x; default float32 for bit-faithful checks.
    """
    n1, d = e1.shape
    n2, d2 = e2.shape
    k = wm.shape[0]
    assert d == d2 == wm.shape[1] == wm.shape[2]
    assert w1.shape == (2 * k, k) and w2.shape == (k, 2 * k) and w3.shape == (1, k)

    # Tile sizes: rows sublane-aligned (8), columns lane-aligned (128).
    if tile_m is None:
        tile_m = min(128, _round_up(n1, 8))
    if tile_n is None:
        tile_n = min(512, _round_up(n2, 128))
    tm = _round_up(tile_m, 8)
    tn = _round_up(tile_n, 128)
    n1p = _round_up(n1, tm)
    n2p = _round_up(n2, tn)

    f32 = jnp.float32
    # One-time layout work done in XLA, outside the kernel:
    e1p = jnp.zeros((n1p, d), f32).at[:n1, :].set(e1.astype(f32)).astype(bilinear_dtype)
    e2t = jnp.zeros((d, n2p), f32).at[:, :n2].set(e2.astype(f32).T).astype(bilinear_dtype)
    # Fused stage-1 weight:  W_flat[dd, a*d + e] = wm[a, dd, e]   -> (d, k*d)
    wflat = jnp.transpose(wm.astype(f32), (1, 0, 2)).reshape(d, k * d).astype(bilinear_dtype)

    w1c = w1.astype(f32)                           # (2k, k)  used untransposed
    b1c = b1.reshape(2 * k, 1).astype(f32)
    w2c = w2.astype(f32)                           # (k, 2k)
    b2c = b2.reshape(k, 1).astype(f32)
    w3c = w3.reshape(1, k).astype(f32)             # (1, k)
    b3c = b3.reshape(1, 1).astype(f32)

    grid = (n1p // tm, n2p // tn)
    const = lambda i, j: (0, 0)

    # TODO(synk): for very large k*d*d (e.g. d>=1024 f32 on v7x's 64 MiB VMEM),
    # stream W_flat from HBM (memory_space=pl.ANY + pltpu.make_async_copy) and/or
    # pass bilinear_dtype=jnp.bfloat16 instead of keeping it VMEM-resident.
    out_p = pl.pallas_call(
        ged_matrix_kernel,
        out_shape=jax.ShapeDtypeStruct((n1p, n2p), jnp.float32),
        grid=grid,
        in_specs=[
            pl.BlockSpec((tm, d), lambda i, j: (i, 0)),       # e1 tile
            pl.BlockSpec((d, k * d), const),                  # fused stage-1 weight (resident)
            pl.BlockSpec((d, tn), lambda i, j: (0, j)),       # e2^T tile
            pl.BlockSpec((2 * k, k), const),                  # MLP weights / biases: resident
            pl.BlockSpec((2 * k, 1), const),
            pl.BlockSpec((k, 2 * k), const),
            pl.BlockSpec((k, 1), const),
            pl.BlockSpec((1, k), const),
            pl.BlockSpec((1, 1), const),
        ],
        out_specs=pl.BlockSpec((tm, tn), lambda i, j: (i, j)),
        scratch_shapes=[pltpu.VMEM((tm, k * d), jnp.float32)],
        compiler_params=pltpu.CompilerParams(
            dimension_semantics=("parallel", "arbitrary"),
            vmem_limit_bytes=48 * 1024 * 1024,
        ),
    )(e1p, wflat, e2t, w1c, b1c, w2c, b2c, w3c, b3c)

    return out_p[:n1, :n2]


# ---------------------------- reference & init ------------------------------

def _xavier_uniform(key, shape):
    # torch.nn.init.xavier_uniform_ on a (k, d, d) tensor: fan_in=d*d, fan_out=k*d
    fan_in = shape[1] * shape[2]
    fan_out = shape[0] * shape[2]
    bound = math.sqrt(6.0 / (fan_in + fan_out))
    return jax.random.uniform(key, shape, jnp.float32, -bound, bound)


def _linear_init(key, out_f, in_f):
    # torch.nn.Linear default init: uniform(-1/sqrt(in_f), 1/sqrt(in_f))
    kw, kb = jax.random.split(key)
    bound = 1.0 / math.sqrt(in_f)
    w = jax.random.uniform(kw, (out_f, in_f), jnp.float32, -bound, bound)
    b = jax.random.uniform(kb, (out_f,), jnp.float32, -bound, bound)
    return w, b


def _reference(e1, e2, wm, w1, b1, w2, b2, w3, b3):
    # Pure-JAX reference matching the PyTorch forward.
    k = wm.shape[0]
    n1, n2 = e1.shape[0], e2.shape[0]
    m = jnp.einsum('id,kde->kie', e1, wm)            # (k, n1, d)
    m = jnp.einsum('kie,je->kij', m, e2)             # (k, n1, n2)
    feats = m.reshape(k, -1).T                       # (n1*n2, k)
    h1 = jnp.maximum(feats @ w1.T + b1, 0.0)
    h2 = jnp.maximum(h1 @ w2.T + b2, 0.0)
    o = h2 @ w3.T + b3
    return o.reshape(n1, n2)


if __name__ == "__main__":
    d, k = 32, 16
    key = jax.random.PRNGKey(0)
    k_wm, k_l1, k_l2, k_l3, k_e = jax.random.split(key, 5)

    weight_matrix = _xavier_uniform(k_wm, (k, d, d))
    w1, b1 = _linear_init(k_l1, 2 * k, k)
    w2, b2 = _linear_init(k_l2, k, 2 * k)
    w3, b3 = _linear_init(k_l3, 1, k)

    cases = [
        # unaligned small shapes, single grid step (exercises padding)
        dict(n1=12, n2=10, tile_m=None, tile_n=None),
        # multi-step (3 x 2) grid with explicit small tiles (exercises pl.when hoist)
        dict(n1=20, n2=140, tile_m=8, tile_n=128),
    ]
    for ci, c in enumerate(cases):
        ke1, ke2 = jax.random.split(jax.random.fold_in(k_e, ci))
        e1 = jax.random.normal(ke1, (c["n1"], d), jnp.float32)
        e2 = jax.random.normal(ke2, (c["n2"], d), jnp.float32)

        out = ged_matrix_forward(e1, e2, weight_matrix, w1, b1, w2, b2, w3, b3,
                                 tile_m=c["tile_m"], tile_n=c["tile_n"])
        out = jax.block_until_ready(out)

        ref = _reference(e1, e2, weight_matrix, w1, b1, w2, b2, w3, b3)
        assert out.shape == (c["n1"], c["n2"])
        err = float(jnp.max(jnp.abs(out - ref)))
        assert jnp.allclose(out, ref, atol=1e-3, rtol=1e-3), f"case {ci}: max abs err {err}"

    print("KERNEL_OK")
</pallas_src>

<mosaic_0001>
module attributes {stable_mosaic.version = 11 : i64} {
  func.func @ged_matrix_kernel(%arg0: i32, %arg1: i32, %arg2: memref<16x32xf32, #tpu.memory_space<vmem>>, %arg3: memref<32x512xf32, #tpu.memory_space<vmem>>, %arg4: memref<32x128xf32, #tpu.memory_space<vmem>>, %arg5: memref<32x16xf32, #tpu.memory_space<vmem>>, %arg6: memref<32x1xf32, #tpu.memory_space<vmem>>, %arg7: memref<16x32xf32, #tpu.memory_space<vmem>>, %arg8: memref<16x1xf32, #tpu.memory_space<vmem>>, %arg9: memref<1x16xf32, #tpu.memory_space<vmem>>, %arg10: memref<1x1xf32, #tpu.memory_space<vmem>>, %arg11: memref<16x128xf32, #tpu.memory_space<vmem>>, %arg12: memref<16x512xf32, #tpu.memory_space<vmem>>) attributes {dimension_semantics = [#tpu.dimension_semantics<parallel>, #tpu.dimension_semantics<arbitrary>], iteration_bounds = array<i64: 1, 1>, scalar_prefetch = 0 : i64, scratch_operands = 1 : i64, tpu.core_type = #tpu.core_type<tc>, window_params = [{transform_indices = @transform_0, window_bounds = array<i64: 16, 32>}, {pipeline_mode = #tpu.pipeline_mode<synchronous>, transform_indices = @transform_1, window_bounds = array<i64: 32, 512>}, {transform_indices = @transform_2, window_bounds = array<i64: 32, 128>}, {pipeline_mode = #tpu.pipeline_mode<synchronous>, transform_indices = @transform_3, window_bounds = array<i64: 32, 16>}, {pipeline_mode = #tpu.pipeline_mode<synchronous>, transform_indices = @transform_4, window_bounds = array<i64: 32, 1>}, {pipeline_mode = #tpu.pipeline_mode<synchronous>, transform_indices = @transform_5, window_bounds = array<i64: 16, 32>}, {pipeline_mode = #tpu.pipeline_mode<synchronous>, transform_indices = @transform_6, window_bounds = array<i64: 16, 1>}, {pipeline_mode = #tpu.pipeline_mode<synchronous>, transform_indices = @transform_7, window_bounds = array<i64: 1, 16>}, {pipeline_mode = #tpu.pipeline_mode<synchronous>, transform_indices = @transform_8, window_bounds = array<i64: 1, 1>}, {transform_indices = @transform_9, window_bounds = array<i64: 16, 128>}]} {
    %c0_i32 = arith.constant 0 : i32
    %0 = arith.cmpi eq, %arg1, %c0_i32 : i32
    %1 = arith.extui %0 : i1 to i32
    %c0_i32_0 = arith.constant 0 : i32
    %2 = arith.cmpi ne, %1, %c0_i32_0 : i32
    scf.if %2 {
      %c0_53 = arith.constant 0 : index
      %c0_54 = arith.constant 0 : index
      %75 = vector.load %arg2[%c0_53, %c0_54] : memref<16x32xf32, #tpu.memory_space<vmem>>, vector<16x32xf32>
      %c0_55 = arith.constant 0 : index
      %c0_56 = arith.constant 0 : index
      %76 = vector.load %arg3[%c0_55, %c0_56] : memref<32x512xf32, #tpu.memory_space<vmem>>, vector<32x512xf32>
      %cst_57 = arith.constant dense<0.000000e+00> : vector<16x512xf32>
      %77 = tpu.matmul %75, %76, %cst_57 {dimension_numbers = #tpu.dot_dimension_numbers<[1], [0], [0], [1], [0, 0, 1, 1], [], []>} : vector<16x32xf32>, vector<32x512xf32>, vector<16x512xf32> -> vector<16x512xf32>
      %c0_58 = arith.constant 0 : index
      %c0_59 = arith.constant 0 : index
      %78 = vector.load %arg12[%c0_58, %c0_59] : memref<16x512xf32, #tpu.memory_space<vmem>>, vector<16x512xf32>
      tpu.vector_store %arg12[%c0_58, %c0_59], %77 {strides = array<i32>} : memref<16x512xf32, #tpu.memory_space<vmem>>, vector<16x512xf32>,
    } else {
    }
    %c0 = arith.constant 0 : index
    %c0_1 = arith.constant 0 : index
    %3 = vector.load %arg4[%c0, %c0_1] : memref<32x128xf32, #tpu.memory_space<vmem>>, vector<32x128xf32>
    %c0_2 = arith.constant 0 : index
    %c0_3 = arith.constant 0 : index
    %4 = vector.load %arg12[%c0_2, %c0_3] : memref<16x512xf32, #tpu.memory_space<vmem>>, vector<16x32xf32>
    %cst = arith.constant dense<0.000000e+00> : vector<16x128xf32>
    %5 = tpu.matmul %4, %3, %cst {dimension_numbers = #tpu.dot_dimension_numbers<[1], [0], [0], [1], [0, 0, 1, 1], [], []>} : vector<16x32xf32>, vector<32x128xf32>, vector<16x128xf32> -> vector<16x128xf32>
    %c0_4 = arith.constant 0 : index
    %c32 = arith.constant 32 : index
    %6 = vector.load %arg12[%c0_4, %c32] : memref<16x512xf32, #tpu.memory_space<vmem>>, vector<16x32xf32>
    %cst_5 = arith.constant dense<0.000000e+00> : vector<16x128xf32>
    %7 = tpu.matmul %6, %3, %cst_5 {dimension_numbers = #tpu.dot_dimension_numbers<[1], [0], [0], [1], [0, 0, 1, 1], [], []>} : vector<16x32xf32>, vector<32x128xf32>, vector<16x128xf32> -> vector<16x128xf32>
    %c0_6 = arith.constant 0 : index
    %c64 = arith.constant 64 : index
    %8 = vector.load %arg12[%c0_6, %c64] : memref<16x512xf32, #tpu.memory_space<vmem>>, vector<16x32xf32>
    %cst_7 = arith.constant dense<0.000000e+00> : vector<16x128xf32>
    %9 = tpu.matmul %8, %3, %cst_7 {dimension_numbers = #tpu.dot_dimension_numbers<[1], [0], [0], [1], [0, 0, 1, 1], [], []>} : vector<16x32xf32>, vector<32x128xf32>, vector<16x128xf32> -> vector<16x128xf32>
    %c0_8 = arith.constant 0 : index
    %c96 = arith.constant 96 : index
    %10 = vector.load %arg12[%c0_8, %c96] : memref<16x512xf32, #tpu.memory_space<vmem>>, vector<16x32xf32>
    %cst_9 = arith.constant dense<0.000000e+00> : vector<16x128xf32>
    %11 = tpu.matmul %10, %3, %cst_9 {dimension_numbers = #tpu.dot_dimension_numbers<[1], [0], [0], [1], [0, 0, 1, 1], [], []>} : vector<16x32xf32>, vector<32x128xf32>, vector<16x128xf32> -> vector<16x128xf32>
    %c0_10 = arith.constant 0 : index
    %c128 = arith.constant 128 : index
    %12 = vector.load %arg12[%c0_10, %c128] : memref<16x512xf32, #tpu.memory_space<vmem>>, vector<16x32xf32>
    %cst_11 = arith.constant dense<0.000000e+00> : vector<16x128xf32>
    %13 = tpu.matmul %12, %3, %cst_11 {dimension_numbers = #tpu.dot_dimension_numbers<[1], [0], [0], [1], [0, 0, 1, 1], [], []>} : vector<16x32xf32>, vector<32x128xf32>, vector<16x128xf32> -> vector<16x128xf32>
    %c0_12 = arith.constant 0 : index
    %c160 = arith.constant 160 : index
    %14 = vector.load %arg12[%c0_12, %c160] : memref<16x512xf32, #tpu.memory_space<vmem>>, vector<16x32xf32>
    %cst_13 = arith.constant dense<0.000000e+00> : vector<16x128xf32>
    %15 = tpu.matmul %14, %3, %cst_13 {dimension_numbers = #tpu.dot_dimension_numbers<[1], [0], [0], [1], [0, 0, 1, 1], [], []>} : vector<16x32xf32>, vector<32x128xf32>, vector<16x128xf32> -> vector<16x128xf32>
    %c0_14 = arith.constant 0 : index
    %c192 = arith.constant 192 : index
    %16 = vector.load %arg12[%c0_14, %c192] : memref<16x512xf32, #tpu.memory_space<vmem>>, vector<16x32xf32>
    %cst_15 = arith.constant dense<0.000000e+00> : vector<16x128xf32>
    %17 = tpu.matmul %16, %3, %cst_15 {dimension_numbers = #tpu.dot_dimension_numbers<[1], [0], [0], [1], [0, 0, 1, 1], [], []>} : vector<16x32xf32>, vector<32x128xf32>, vector<16x128xf32> -> vector<16x128xf32>
    %c0_16 = arith.constant 0 : index
    %c224 = arith.constant 224 : index
    %18 = vector.load %arg12[%c0_16, %c224] : memref<16x512xf32, #tpu.memory_space<vmem>>, vector<16x32xf32>
    %cst_17 = arith.constant dense<0.000000e+00> : vector<16x128xf32>
    %19 = tpu.matmul %18, %3, %cst_17 {dimension_numbers = #tpu.dot_dimension_numbers<[1], [0], [0], [1], [0, 0, 1, 1], [], []>} : vector<16x32xf32>, vector<32x128xf32>, vector<16x128xf32> -> vector<16x128xf32>
    %c0_18 = arith.constant 0 : index
    %c256 = arith.constant 256 : index
    %20 = vector.load %arg12[%c0_18, %c256] : memref<16x512xf32, #tpu.memory_space<vmem>>, vector<16x32xf32>
    %cst_19 = arith.constant dense<0.000000e+00> : vector<16x128xf32>
    %21 = tpu.matmul %20, %3, %cst_19 {dimension_numbers = #tpu.dot_dimension_numbers<[1], [0], [0], [1], [0, 0, 1, 1], [], []>} : vector<16x32xf32>, vector<32x128xf32>, vector<16x128xf32> -> vector<16x128xf32>
    %c0_20 = arith.constant 0 : index
    %c288 = arith.constant 288 : index
    %22 = vector.load %arg12[%c0_20, %c288] : memref<16x512xf32, #tpu.memory_space<vmem>>, vector<16x32xf32>
    %cst_21 = arith.constant dense<0.000000e+00> : vector<16x128xf32>
    %23 = tpu.matmul %22, %3, %cst_21 {dimension_numbers = #tpu.dot_dimension_numbers<[1], [0], [0], [1], [0, 0, 1, 1], [], []>} : vector<16x32xf32>, vector<32x128xf32>, vector<16x128xf32> -> vector<16x128xf32>
    %c0_22 = arith.constant 0 : index
    %c320 = arith.constant 320 : index
    %24 = vector.load %arg12[%c0_22, %c320] : memref<16x512xf32, #tpu.memory_space<vmem>>, vector<16x32xf32>
    %cst_23 = arith.constant dense<0.000000e+00> : vector<16x128xf32>
    %25 = tpu.matmul %24, %3, %cst_23 {dimension_numbers = #tpu.dot_dimension_numbers<[1], [0], [0], [1], [0, 0, 1, 1], [], []>} : vector<16x32xf32>, vector<32x128xf32>, vector<16x128xf32> -> vector<16x128xf32>
    %c0_24 = arith.constant 0 : index
    %c352 = arith.constant 352 : index
    %26 = vector.load %arg12[%c0_24, %c352] : memref<16x512xf32, #tpu.memory_space<vmem>>, vector<16x32xf32>
    %cst_25 = arith.constant dense<0.000000e+00> : vector<16x128xf32>
    %27 = tpu.matmul %26, %3, %cst_25 {dimension_numbers = #tpu.dot_dimension_numbers<[1], [0], [0], [1], [0, 0, 1, 1], [], []>} : vector<16x32xf32>, vector<32x128xf32>, vector<16x128xf32> -> vector<16x128xf32>
    %c0_26 = arith.constant 0 : index
    %c384 = arith.constant 384 : index
    %28 = vector.load %arg12[%c0_26, %c384] : memref<16x512xf32, #tpu.memory_space<vmem>>, vector<16x32xf32>
    %cst_27 = arith.constant dense<0.000000e+00> : vector<16x128xf32>
    %29 = tpu.matmul %28, %3, %cst_27 {dimension_numbers = #tpu.dot_dimension_numbers<[1], [0], [0], [1], [0, 0, 1, 1], [], []>} : vector<16x32xf32>, vector<32x128xf32>, vector<16x128xf32> -> vector<16x128xf32>
    %c0_28 = arith.constant 0 : index
    %c416 = arith.constant 416 : index
    %30 = vector.load %arg12[%c0_28, %c416] : memref<16x512xf32, #tpu.memory_space<vmem>>, vector<16x32xf32>
    %cst_29 = arith.constant dense<0.000000e+00> : vector<16x128xf32>
    %31 = tpu.matmul %30, %3, %cst_29 {dimension_numbers = #tpu.dot_dimension_numbers<[1], [0], [0], [1], [0, 0, 1, 1], [], []>} : vector<16x32xf32>, vector<32x128xf32>, vector<16x128xf32> -> vector<16x128xf32>
    %c0_30 = arith.constant 0 : index
    %c448 = arith.constant 448 : index
    %32 = vector.load %arg12[%c0_30, %c448] : memref<16x512xf32, #tpu.memory_space<vmem>>, vector<16x32xf32>
    %cst_31 = arith.constant dense<0.000000e+00> : vector<16x128xf32>
    %33 = tpu.matmul %32, %3, %cst_31 {dimension_numbers = #tpu.dot_dimension_numbers<[1], [0], [0], [1], [0, 0, 1, 1], [], []>} : vector<16x32xf32>, vector<32x128xf32>, vector<16x128xf32> -> vector<16x128xf32>
    %c0_32 = arith.constant 0 : index
    %c480 = arith.constant 480 : index
    %34 = vector.load %arg12[%c0_32, %c480] : memref<16x512xf32, #tpu.memory_space<vmem>>, vector<16x32xf32>
    %cst_33 = arith.constant dense<0.000000e+00> : vector<16x128xf32>
    %35 = tpu.matmul %34, %3, %cst_33 {dimension_numbers = #tpu.dot_dimension_numbers<[1], [0], [0], [1], [0, 0, 1, 1], [], []>} : vector<16x32xf32>, vector<32x128xf32>, vector<16x128xf32> -> vector<16x128xf32>
    %36 = vector.shape_cast %5 : vector<16x128xf32> to vector<1x16x128xf32>
    %37 = vector.shape_cast %7 : vector<16x128xf32> to vector<1x16x128xf32>
    %38 = vector.shape_cast %9 : vector<16x128xf32> to vector<1x16x128xf32>
    %39 = vector.shape_cast %11 : vector<16x128xf32> to vector<1x16x128xf32>
    %40 = vector.shape_cast %13 : vector<16x128xf32> to vector<1x16x128xf32>
    %41 = vector.shape_cast %15 : vector<16x128xf32> to vector<1x16x128xf32>
    %42 = vector.shape_cast %17 : vector<16x128xf32> to vector<1x16x128xf32>
    %43 = vector.shape_cast %19 : vector<16x128xf32> to vector<1x16x128xf32>
    %44 = vector.shape_cast %21 : vector<16x128xf32> to vector<1x16x128xf32>
    %45 = vector.shape_cast %23 : vector<16x128xf32> to vector<1x16x128xf32>
    %46 = vector.shape_cast %25 : vector<16x128xf32> to vector<1x16x128xf32>
    %47 = vector.shape_cast %27 : vector<16x128xf32> to vector<1x16x128xf32>
    %48 = vector.shape_cast %29 : vector<16x128xf32> to vector<1x16x128xf32>
    %49 = vector.shape_cast %31 : vector<16x128xf32> to vector<1x16x128xf32>
    %50 = vector.shape_cast %33 : vector<16x128xf32> to vector<1x16x128xf32>
    %51 = vector.shape_cast %35 : vector<16x128xf32> to vector<1x16x128xf32>
    %52 = tpu.concatenate %36, %37, %38, %39, %40, %41, %42, %43, %44, %45, %46, %47, %48, %49, %50, %51 in 0 : vector<1x16x128xf32>, vector<1x16x128xf32>, vector<1x16x128xf32>, vector<1x16x128xf32>, vector<1x16x128xf32>, vector<1x16x128xf32>, vector<1x16x128xf32>, vector<1x16x128xf32>, vector<1x16x128xf32>, vector<1x16x128xf32>, vector<1x16x128xf32>, vector<1x16x128xf32>, vector<1x16x128xf32>, vector<1x16x128xf32>, vector<1x16x128xf32>, vector<1x16x128xf32> -> vector<16x16x128xf32>
    %53 = vector.shape_cast %52 : vector<16x16x128xf32> to vector<16x2048xf32>
    %c0_34 = arith.constant 0 : index
    %c0_35 = arith.constant 0 : index
    %54 = vector.load %arg5[%c0_34, %c0_35] : memref<32x16xf32, #tpu.memory_space<vmem>>, vector<32x16xf32>
    %cst_36 = arith.constant dense<0.000000e+00> : vector<32x2048xf32>
    %55 = tpu.matmul %54, %53, %cst_36 {dimension_numbers = #tpu.dot_dimension_numbers<[1], [0], [0], [1], [0, 0, 1, 1], [], []>} : vector<32x16xf32>, vector<16x2048xf32>, vector<32x2048xf32> -> vector<32x2048xf32>
    %c0_37 = arith.constant 0 : index
    %c0_38 = arith.constant 0 : index
    %56 = vector.load %arg6[%c0_37, %c0_38] : memref<32x1xf32, #tpu.memory_space<vmem>>, vector<32x1xf32>
    %57 = vector.broadcast %56 : vector<32x1xf32> to vector<32x2048xf32>
    %58 = arith.addf %55, %57 : vector<32x2048xf32>
    %cst_39 = arith.constant 0.000000e+00 : f32
    %59 = vector.broadcast %cst_39 : f32 to vector<32x2048xf32>
    %60 = arith.maximumf %58, %59 : vector<32x2048xf32>
    %c0_40 = arith.constant 0 : index
    %c0_41 = arith.constant 0 : index
    %61 = vector.load %arg7[%c0_40, %c0_41] : memref<16x32xf32, #tpu.memory_space<vmem>>, vector<16x32xf32>
    %cst_42 = arith.constant dense<0.000000e+00> : vector<16x2048xf32>
    %62 = tpu.matmul %61, %60, %cst_42 {dimension_numbers = #tpu.dot_dimension_numbers<[1], [0], [0], [1], [0, 0, 1, 1], [], []>} : vector<16x32xf32>, vector<32x2048xf32>, vector<16x2048xf32> -> vector<16x2048xf32>
    %c0_43 = arith.constant 0 : index
    %c0_44 = arith.constant 0 : index
    %63 = vector.load %arg8[%c0_43, %c0_44] : memref<16x1xf32, #tpu.memory_space<vmem>>, vector<16x1xf32>
    %64 = vector.broadcast %63 : vector<16x1xf32> to vector<16x2048xf32>
    %65 = arith.addf %62, %64 : vector<16x2048xf32>
    %cst_45 = arith.constant 0.000000e+00 : f32
    %66 = vector.broadcast %cst_45 : f32 to vector<16x2048xf32>
    %67 = arith.maximumf %65, %66 : vector<16x2048xf32>
    %c0_46 = arith.constant 0 : index
    %c0_47 = arith.constant 0 : index
    %68 = vector.load %arg9[%c0_46, %c0_47] : memref<1x16xf32, #tpu.memory_space<vmem>>, vector<1x16xf32>
    %cst_48 = arith.constant dense<0.000000e+00> : vector<1x2048xf32>
    %69 = tpu.matmul %68, %67, %cst_48 {dimension_numbers = #tpu.dot_dimension_numbers<[1], [0], [0], [1], [0, 0, 1, 1], [], []>} : vector<1x16xf32>, vector<16x2048xf32>, vector<1x2048xf32> -> vector<1x2048xf32>
    %c0_49 = arith.constant 0 : index
    %c0_50 = arith.constant 0 : index
    %70 = vector.load %arg10[%c0_49, %c0_50] : memref<1x1xf32, #tpu.memory_space<vmem>>, vector<1x1xf32>
    %71 = vector.broadcast %70 : vector<1x1xf32> to vector<1x2048xf32>
    %72 = arith.addf %69, %71 : vector<1x2048xf32>
    %73 = vector.shape_cast %72 : vector<1x2048xf32> to vector<16x128xf32>
    %c0_51 = arith.constant 0 : index
    %c0_52 = arith.constant 0 : index
    %74 = vector.load %arg11[%c0_51, %c0_52] : memref<16x128xf32, #tpu.memory_space<vmem>>, vector<16x128xf32>
    tpu.vector_store %arg11[%c0_51, %c0_52], %73 {strides = array<i32>} : memref<16x128xf32, #tpu.memory_space<vmem>>, vector<16x128xf32>,
    return
  }
  func.func @transform_0(%arg0: i32, %arg1: i32) -> (i32, i32) {
    %c0_i32 = arith.constant 0 : i32
    %c0_i32_0 = arith.constant 0 : i32
    return %arg0, %c0_i32 : i32, i32
  }
  func.func @transform_1(%arg0: i32, %arg1: i32) -> (i32, i32) {
    %c0_i32 = arith.constant 0 : i32
    %c0_i32_0 = arith.constant 0 : i32
    %c0_i32_1 = arith.constant 0 : i32
    return %c0_i32, %c0_i32_0 : i32, i32
  }
  func.func @transform_2(%arg0: i32, %arg1: i32) -> (i32, i32) {
    %c0_i32 = arith.constant 0 : i32
    %c0_i32_0 = arith.constant 0 : i32
    return %c0_i32, %arg1 : i32, i32
  }
  func.func @transform_3(%arg0: i32, %arg1: i32) -> (i32, i32) {
    %c0_i32 = arith.constant 0 : i32
    %c0_i32_0 = arith.constant 0 : i32
    %c0_i32_1 = arith.constant 0 : i32
    return %c0_i32, %c0_i32_0 : i32, i32
  }
  func.func @transform_4(%arg0: i32, %arg1: i32) -> (i32, i32) {
    %c0_i32 = arith.constant 0 : i32
    %c0_i32_0 = arith.constant 0 : i32
    %c0_i32_1 = arith.constant 0 : i32
    return %c0_i32, %c0_i32_0 : i32, i32
  }
  func.func @transform_5(%arg0: i32, %arg1: i32) -> (i32, i32) {
    %c0_i32 = arith.constant 0 : i32
    %c0_i32_0 = arith.constant 0 : i32
    %c0_i32_1 = arith.constant 0 : i32
    return %c0_i32, %c0_i32_0 : i32, i32
  }
  func.func @transform_6(%arg0: i32, %arg1: i32) -> (i32, i32) {
    %c0_i32 = arith.constant 0 : i32
    %c0_i32_0 = arith.constant 0 : i32
    %c0_i32_1 = arith.constant 0 : i32
    return %c0_i32, %c0_i32_0 : i32, i32
  }
  func.func @transform_7(%arg0: i32, %arg1: i32) -> (i32, i32) {
    %c0_i32 = arith.constant 0 : i32
    %c0_i32_0 = arith.constant 0 : i32
    %c0_i32_1 = arith.constant 0 : i32
    return %c0_i32, %c0_i32_0 : i32, i32
  }
  func.func @transform_8(%arg0: i32, %arg1: i32) -> (i32, i32) {
    %c0_i32 = arith.constant 0 : i32
    %c0_i32_0 = arith.constant 0 : i32
    %c0_i32_1 = arith.constant 0 : i32
    return %c0_i32, %c0_i32_0 : i32, i32
  }
  func.func @transform_9(%arg0: i32, %arg1: i32) -> (i32, i32) {
    %c0_i32 = arith.constant 0 : i32
    return %arg0, %arg1 : i32, i32
  }
}

</mosaic_0001>

<bundles_post_ra>
// kernel: tpu_custom_call.1
= control target key start
LH: loop header
LB: loop body
LE: loop exit
PB: predicated region body
PF: predicated region fallthrough
CT: control target
= control target key end

     0   :  { %s5758_s0 = inlined_call_operand.vmem [shape: f32[16,32], index: 0, kind: input, shape index: {}]   ;;  %s5759_s1 = inlined_call_operand.hbm [shape: f32[32,512], index: 1, kind: input, shape index: {}]   ;;  %s5760_s2 = inlined_call_operand.vmem [shape: f32[32,128], index: 2, kind: input, shape index: {}]   ;;  %s5761_s3 = inlined_call_operand.vmem [shape: f32[32,16], index: 3, kind: input, shape index: {}]   ;;  %s5762_s4 = inlined_call_operand.vmem [shape: f32[32,1], index: 4, kind: input, shape index: {}]   ;;  %s5763_s5 = inlined_call_operand.vmem [shape: f32[16,32], index: 5, kind: input, shape index: {}]   ;;  %s5764_s6 = inlined_call_operand.vmem [shape: f32[16,1], index: 6, kind: input, shape index: {}]   ;;  %s5765_s7 = inlined_call_operand.vmem [shape: f32[1,16], index: 7, kind: input, shape index: {}]   ;;  %s5766_s8 = inlined_call_operand.<no memory space> [shape: f32[1,1], index: 8, kind: input, shape index: {}]   ;;  %s5767_s9 = inlined_call_operand.hbm [shape: f32[16,128], index: 9, kind: output, shape index: {}]  }
   0x1   :  { %v14_v0 = vstv %s5766_s8 }
   0x2   :  { %15 = vst [vmem:[#allocation3] sm:$0x1] %v14_v0 }
   0x3   :  { %16 = vsyncpa [#allocation5], 0 }
   0x4   :  { %17 = vsyncpa [#allocation6], 0  ;;  %s4994_s11 = smov [#allocation4]   ;;  %s4946_s15 = scalar_lea.hbm %s5759_s1, 2048 }
   0x5   :  { %s25_s12 = sshll.u32 %s4994_s11, 4  ;;  %p4947_p0 = scmp.ne.s32.totalorder %s5759_s1, %s4946_s15  ;;  %s26_s12 = int_to_ptr.vmem [resolvable:$true] %s25_s12 }
   0x6   :  { %p4950_p1 = scmp.lt.u32.totalorder %s4946_s15, %s5759_s1 }
   0x8   :  { %p4952_p2 = pnand %p4950_p1, %p4947_p0 }
   0xa   :  { %4955 = shalt.err (!%p4952_p2)
}
   0xb   :  { %s4956_s8 = scalar_lea.vmem %s26_s12, 2048  ;;  %p4961_p4 = scmp.lt.s32.totalorder %s26_s12, %s26_s12 }
   0xc   :  { %p4957_p3 = scmp.ne.s32.totalorder %s26_s12, %s4956_s8  ;;  %p4962_p5 = scmp.lt.s32.totalorder %s4956_s8, %s4956_s8 }
   0xe   :  { %p4963_p6 = por %p4962_p5, %p4961_p4 }
  0x10   :  { %p4964_p7 = pnand %p4963_p6, %p4957_p3 }
  0x12   :  { %4967 = shalt.err (!%p4964_p7)
}
  0x13   :  { %s4995_s20 = smov 512   ;;  %s4996_s21 = smov 32  }
  0x14   :  { %31 = dma.hbm_to_vmem [thread:$0]  %s5759_s1, 2048, %s26_s12, [#allocation5], %s4995_s20, %s4995_s20, %s4996_s21  }
  0x15   :  { %4990 = dma.done.wait [#allocation5], 2048  }
  0x16   :  { %4991 = vsyncadd [#allocation5], 4294965248  ;;  %v5768_v1 = vmov 0.0   ;;  %v56_v2 = vld [vmem:[#allocation4 + $0x8] sm:$0xff]  ;;  %v55_v4 = vld [vmem:[#allocation4] sm:$0xff]  ;;  %vm71_vm0 = vcmask 261120  }
  0x17   :  { %142 = vmatprep.mubr.f32.mxu0 %v5768_v1  ;;  %219 = vmatprep.mubr.f32.mxu1 %v5768_v1  ;;  %v60_v3 = vld [vmem:[#allocation4 + $0x28] sm:$0xff]  ;;  %v59_v6 = vld [vmem:[#allocation4 + $0x20] sm:$0xff]  ;;  %v58_v13 = vld [vmem:[#allocation4 + $0x18] sm:$0xff]  ;;  %s4998_s13 = smov 64   ;;  %s4999_s14 = smov 96   ;;  %vm2145_vm1 = vcmask 130048  }
  0x18   :  { %v4660_v5 = vpack.c.bf16 %v60_v3, %v56_v2  ;;  %v64_v7 = vld [vmem:[#allocation4 + $0x48] sm:$0xff]  ;;  %v4662_v9 = vpack.c.bf16 %v59_v6, %v55_v4  ;;  %v63_v11 = vld [vmem:[#allocation4 + $0x40] sm:$0xff]  ;;  %v62_v14 = vld [vmem:[#allocation4 + $0x38] sm:$0xff] }
  0x19   :  { %v68_v8 = vld [vmem:[#allocation4 + $0x68] sm:$0xff]  ;;  %v67_v12 = vld [vmem:[#allocation4 + $0x60] sm:$0xff]  ;;  %v4668_v16 = vpack.c.bf16 %v62_v14, %v58_v13  ;;  %v57_v17 = vld [vmem:[#allocation4 + $0x10] sm:$0xff] }
  0x1a   :  { %v4664_v10 = vpack.c.bf16 %v68_v8, %v64_v7  ;;  %4661 = vmatprep.subr.bf16.mxu0 %v4660_v5  ;;  %v4666_v15 = vpack.c.bf16 %v67_v12, %v63_v11  ;;  %v61_v18 = vld [vmem:[#allocation4 + $0x30] sm:$0xff]  ;;  %v66_v19 = vld [vmem:[#allocation4 + $0x58] sm:$0xff]  ;;  %v241_v26 = vld [vmem:[%s5760_s2 + $0x8] sm:$0xff]  ;;  %v5000_v5 = vmov 1983009808   ;;  %v1578_v7 = vlaneseq }
  0x1b   :  { %4663 = vmatpush1.bf16.msra.mxu0 %v4662_v9  ;;  %v4670_v20 = vpack.c.bf16 %v61_v18, %v57_v17  ;;  %v70_v21 = vld [vmem:[#allocation4 + $0x78] sm:$0xff]  ;;  %v65_v22 = vld [vmem:[#allocation4 + $0x50] sm:$0xff]  ;;  %4669 = vmatprep.subr.bf16.mxu1 %v4668_v16  ;;  %v54_v30 = vld [vmem:[%s5758_s0 + $0x8] sm:$0xff]  ;;  %v1576_v6 = vunpack.c.l.s4 %v5000_v5 }
  0x1c   :  { %4665 = vmatprep.subr.bf16.mxu0 %v4664_v10  ;;  %v69_v23 = vld [vmem:[#allocation4 + $0x70] sm:$0xff]  ;;  %v4672_v24 = vpack.c.bf16 %v70_v21, %v66_v19  ;;  %v240_v25 = vld [vmem:[%s5760_s2] sm:$0xff]  ;;  %v5248_v11 = vshrl.u32 %v1578_v7, 7  ;;  %v5001_v21 = vmov 0  }
  0x1d   :  { %4671 = vmatpush1.bf16.msra.mxu1 %v4670_v20  ;;  %v4674_v27 = vpack.c.bf16 %v69_v23, %v65_v22  ;;  %v5080_v28 = vpack.c.bf16 %v241_v26, %v240_v25  ;;  %v53_v29 = vld [vmem:[%s5758_s0] sm:$0xff]  ;;  %v242_v31 = vld [vmem:[%s5760_s2 + $0x10] sm:$0xff]  ;;  %v243_v32 = vld [vmem:[%s5760_s2 + $0x18] sm:$0xff]  ;;  %v1577_v10 = vunpack.c.0.s8 %v1576_v6  ;;  %4944 = vset.pattern.permute.xlu0 %v5001_v21 }
  0x1e   :  { %4673 = vmatprep.subr.bf16.mxu1 %v4672_v24  ;;  %v5104_v33 = vpack.c.bf16 %v243_v32, %v242_v31  ;;  %v2121_v19 = vld [vmem:[%s5762_s4] sm:$0xff]  ;;  %v2122_v20 = vld [vmem:[%s5762_s4 + $0x8] sm:$0xff]  ;;  %4945 = vset.pattern.permute.xlu1 %v5001_v21  ;;  %v2123_v26 = vld [vmem:[%s5762_s4 + $0x10] sm:$0xff] }
  0x1f   :  { %4667 = vmatpush1.bf16.msra.mxu0 %v4666_v15  ;;  %v5251_v16 = vsub.s32 %v1577_v10, %v5248_v11 }
  0x20   :  { %4677 = vmatprep.subr.bf16.mxu0 %v5080_v28 }
  0x21   :  { %4675 = vmatpush1.bf16.msra.mxu1 %v4674_v27  ;;  %v2124_v27 = vld [vmem:[%s5762_s4 + $0x18] sm:$0xff] }
  0x22   :  { %4296 = vmatmul.mubr.msk.f32.vlgmr.msra.gmra.mrb[0].mxu0 %vm71_vm0, %v53_v29  ;;  %4685 = vmatprep.subr.bf16.mxu1 %v5080_v28 }
  0x23   :  { %148 = vmatprep.mubr.f32.mxu0 %v5768_v1  ;;  %4679 = vmatpush3.bf16.msra.mxu0 %v5080_v28 }
  0x24   :  { %4298 = vmatmul.mubr.msk.f32.vlgmr.msra.gmra.mrb[0].mxu1 %vm71_vm0, %v53_v29  ;;  %4681 = vmatprep.subr.bf16.mxu0 %v5104_v33 }
  0x25   :  { %225 = vmatprep.mubr.f32.mxu1 %v5768_v1  ;;  %4687 = vmatpush3.bf16.msra.mxu1 %v5080_v28 }
  0x26   :  { %4297 = vmatmul.mubr.msk.f32.gmra.mrb[2].mxu0 %vm71_vm0, %v54_v30  ;;  %4689 = vmatprep.subr.bf16.mxu1 %v5104_v33 }
  0x27   :  { %4683 = vmatpush3.bf16.msra.mxu0 %v5104_v33 }
  0x28   :  { %4299 = vmatmul.mubr.msk.f32.gmra.mrb[2].mxu1 %vm71_vm0, %v54_v30  ;;  %4693 = vmatprep.subr.bf16.mxu0 %v5080_v28 }
  0x29   :  { %4691 = vmatpush3.bf16.msra.mxu1 %v5104_v33 }
  0x2a   :  { %4701 = vmatprep.subr.bf16.mxu1 %v5080_v28 }
  0xf5   :  { %v144_v34 = vpop.f32.mrb[0].mxu0 }
  0xf6   :  { %411 = vrot.lane.b32.xlu1 %v144_v34, %s4998_s13  ;;  %328 = vrot.lane.b32.xlu0 %v144_v34, %s4999_s14  ;;  %v146_v35 = vpop.f32.mrb[1].mxu0 }
  0xf7   :  { %4492 = vmatprep.mubr.msk.f32.mxu0 %vm71_vm0, %v144_v34  ;;  %v5115_v36 = vpop.f32.mrb[0].mxu1 }
  0xf8   :  { %v5117_v38 = vpop.f32.mrb[1].mxu1 }
  0xf9   :  { %v150_v37 = vpop.f32.mrb[2].mxu0 }
  0xfa   :  { %494 = vrot.lane.b32.xlu1 %v144_v34, %s4996_s21  ;;  %330 = vrot.lane.b32.xlu0 %v150_v37, %s4999_s14  ;;  %v152_v39 = vpop.f32.mrb[3].mxu0 }
  0xfb   :  { %4493 = vmatmul.mubr.msk.f32.vlgmr.msra.gmra.mrb[4].mxu0 %vm71_vm0, %v150_v37  ;;  %v5122_v40 = vpop.f32.mrb[2].mxu1 }
  0xfc   :  { %4695 = vmatpush3.bf16.msra.mxu0 %v5080_v28  ;;  %v5125_v41 = vpop.f32.mrb[3].mxu1 }
  0xfd   :  { %4697 = vmatprep.subr.bf16.mxu0 %v5104_v33 }
  0xfe   :  { %496 = vrot.lane.b32.xlu1 %v150_v37, %s4996_s21  ;;  %413 = vrot.lane.b32.xlu0 %v150_v37, %s4998_s13 }
 0x100   :  { %4699 = vmatpush3.bf16.msra.mxu0 %v5104_v33 }
 0x101   :  { %4709 = vmatprep.subr.bf16.mxu0 %v5080_v28 }
 0x102   :  { %660 = vrot.lane.b32.xlu0 %v146_v35, %s4999_s14  ;;  %662 = vrot.lane.b32.xlu1 %v152_v39, %s4999_s14 }
 0x106   :  { %743 = vrot.lane.b32.xlu0 %v146_v35, %s4998_s13  ;;  %826 = vrot.lane.b32.xlu1 %v146_v35, %s4996_s21 }
 0x10a   :  { %745 = vrot.lane.b32.xlu0 %v152_v39, %s4998_s13  ;;  %828 = vrot.lane.b32.xlu1 %v152_v39, %s4996_s21 }
 0x10e   :  { %992 = vrot.lane.b32.xlu0 %v5115_v36, %s4999_s14  ;;  %994 = vrot.lane.b32.xlu1 %v5122_v40, %s4999_s14 }
 0x112   :  { %1075 = vrot.lane.b32.xlu0 %v5115_v36, %s4998_s13  ;;  %1158 = vrot.lane.b32.xlu1 %v5115_v36, %s4996_s21 }
 0x116   :  { %1077 = vrot.lane.b32.xlu0 %v5122_v40, %s4998_s13  ;;  %1160 = vrot.lane.b32.xlu1 %v5122_v40, %s4996_s21 }
 0x11a   :  { %1324 = vrot.lane.b32.xlu0 %v5117_v38, %s4999_s14  ;;  %1326 = vrot.lane.b32.xlu1 %v5125_v41, %s4999_s14 }
 0x11e   :  { %1407 = vrot.lane.b32.xlu0 %v5117_v38, %s4998_s13  ;;  %1490 = vrot.lane.b32.xlu1 %v5117_v38, %s4996_s21 }
 0x122   :  { %1409 = vrot.lane.b32.xlu0 %v5125_v41, %s4998_s13  ;;  %1492 = vrot.lane.b32.xlu1 %v5125_v41, %s4996_s21 }
 0x126   :  { %2127 = vperm.xlu0 %4944, %v2121_v19   ;;  %2132 = vperm.xlu1 %4945, %v2122_v20  }
 0x12a   :  { %2137 = vperm.xlu1 %4945, %v2123_v26   ;;  %2142 = vperm.xlu0 %4944, %v2124_v27  }
 0x168   :  { %v412_v42 = vpop.permute.xlu1 %411  ;;  %v329_v43 = vpop.permute.xlu0 %328 }
 0x169   :  { %4503 = vmatprep.mubr.msk.f32.mxu1 %vm71_vm0, %v329_v43  ;;  %4514 = vmatprep.mubr.msk.f32.mxu0 %vm71_vm0, %v412_v42 }
 0x16c   :  { %v495_v44 = vpop.permute.xlu1 %494  ;;  %v331_v45 = vpop.permute.xlu0 %330 }
 0x16d   :  { %4504 = vmatmul.mubr.msk.f32.vlgmr.msra.gmra.mrb[4].mxu1 %vm71_vm0, %v331_v45 }
 0x16e   :  { %4703 = vmatpush3.bf16.msra.mxu1 %v5080_v28  ;;  %4525 = vmatprep.mubr.msk.f32.mxu1 %vm71_vm0, %v495_v44 }
 0x16f   :  { %4705 = vmatprep.subr.bf16.mxu1 %v5104_v33 }
 0x170   :  { %v497_v46 = vpop.permute.xlu1 %496  ;;  %v414_v47 = vpop.permute.xlu0 %413 }
 0x171   :  { %4515 = vmatmul.mubr.msk.f32.vlgmr.msra.gmra.mrb[6].mxu0 %vm71_vm0, %v414_v47 }
 0x172   :  { %4707 = vmatpush3.bf16.msra.mxu1 %v5104_v33  ;;  %4711 = vmatpush3.bf16.msra.mxu0 %v5080_v28 }
 0x173   :  { %4536 = vmatprep.mubr.msk.f32.mxu0 %vm71_vm0, %v146_v35  ;;  %4717 = vmatprep.subr.bf16.mxu1 %v5080_v28 }
 0x174   :  { %v661_v48 = vpop.permute.xlu0 %660  ;;  %4713 = vmatprep.subr.bf16.mxu0 %v5104_v33  ;;  %v663_v49 = vpop.permute.xlu1 %662 }
 0x175   :  { %4526 = vmatmul.mubr.msk.f32.vlgmr.msra.gmra.mrb[6].mxu1 %vm71_vm0, %v497_v46  ;;  %v2936_v46 = vld [vmem:[%s5764_s6] sm:$0xff] }
 0x176   :  { %4715 = vmatpush3.bf16.msra.mxu0 %v5104_v33  ;;  %4719 = vmatpush3.bf16.msra.mxu1 %v5080_v28 }
 0x177   :  { %4547 = vmatprep.mubr.msk.f32.mxu1 %vm71_vm0, %v661_v48  ;;  %4721 = vmatprep.subr.bf16.mxu1 %v5104_v33 }
 0x178   :  { %v744_v50 = vpop.permute.xlu0 %743  ;;  %4725 = vmatprep.subr.bf16.mxu0 %v5080_v28  ;;  %v827_v51 = vpop.permute.xlu1 %826  ;;  %2940 = vperm.xlu1 %4945, %v2936_v46  }
 0x179   :  { %4537 = vmatmul.mubr.msk.f32.vlgmr.msra.gmra.mrb[8].mxu0 %vm71_vm0, %v152_v39 }
 0x17a   :  { %4723 = vmatpush3.bf16.msra.mxu1 %v5104_v33  ;;  %4727 = vmatpush3.bf16.msra.mxu0 %v5080_v28 }
 0x17b   :  { %4558 = vmatprep.mubr.msk.f32.mxu0 %vm71_vm0, %v744_v50  ;;  %4733 = vmatprep.subr.bf16.mxu1 %v5080_v28 }
 0x17c   :  { %v746_v52 = vpop.permute.xlu0 %745  ;;  %4729 = vmatprep.subr.bf16.mxu0 %v5104_v33  ;;  %v829_v53 = vpop.permute.xlu1 %828 }
 0x17d   :  { %4548 = vmatmul.mubr.msk.f32.vlgmr.msra.gmra.mrb[8].mxu1 %vm71_vm0, %v663_v49 }
 0x17e   :  { %4731 = vmatpush3.bf16.msra.mxu0 %v5104_v33  ;;  %4735 = vmatpush3.bf16.msra.mxu1 %v5080_v28 }
 0x17f   :  { %4569 = vmatprep.mubr.msk.f32.mxu1 %vm71_vm0, %v827_v51  ;;  %4737 = vmatprep.subr.bf16.mxu1 %v5104_v33  ;;  %v2937_v51 = vld [vmem:[%s5764_s6 + $0x8] sm:$0xff] }
 0x180   :  { %4741 = vmatprep.subr.bf16.mxu0 %v5080_v28  ;;  %v993_v54 = vpop.permute.xlu0 %992  ;;  %v995_v55 = vpop.permute.xlu1 %994  ;;  %2945 = vperm.xlu0 %4944, %v2937_v51  }
 0x181   :  { %4559 = vmatmul.mubr.msk.f32.vlgmr.msra.gmra.mrb[10].mxu0 %vm71_vm0, %v746_v52 }
 0x182   :  { %4739 = vmatpush3.bf16.msra.mxu1 %v5104_v33  ;;  %4743 = vmatpush3.bf16.msra.mxu0 %v5080_v28 }
 0x183   :  { %4580 = vmatprep.mubr.msk.f32.mxu0 %vm71_vm0, %v5115_v36  ;;  %4749 = vmatprep.subr.bf16.mxu1 %v5080_v28  ;;  %v5002_v36 = vmov 1934713408  }
 0x184   :  { %4745 = vmatprep.subr.bf16.mxu0 %v5104_v33  ;;  %v1076_v56 = vpop.permute.xlu0 %1075  ;;  %v1159_v57 = vpop.permute.xlu1 %1158  ;;  %v1640_v37 = vunpack.c.l.s4 %v5002_v36 }
 0x185   :  { %4570 = vmatmul.mubr.msk.f32.vlgmr.msra.gmra.mrb[10].mxu1 %vm71_vm0, %v829_v53 }
 0x186   :  { %4747 = vmatpush3.bf16.msra.mxu0 %v5104_v33  ;;  %4751 = vmatpush3.bf16.msra.mxu1 %v5080_v28  ;;  %v1641_v52 = vunpack.c.0.s8 %v1640_v37 }
 0x187   :  { %4753 = vmatprep.subr.bf16.mxu1 %v5104_v33  ;;  %4757 = vmatprep.subr.bf16.mxu0 %v5080_v28 }
 0x188   :  { %4591 = vmatprep.mubr.msk.f32.mxu1 %vm71_vm0, %v993_v54  ;;  %v1078_v58 = vpop.permute.xlu0 %1077  ;;  %v1161_v59 = vpop.permute.xlu1 %1160 }
 0x189   :  { %4581 = vmatmul.mubr.msk.f32.vlgmr.msra.gmra.mrb[12].mxu0 %vm71_vm0, %v5122_v40 }
 0x18a   :  { %4755 = vmatpush3.bf16.msra.mxu1 %v5104_v33  ;;  %4759 = vmatpush3.bf16.msra.mxu0 %v5080_v28 }
 0x18b   :  { %4602 = vmatprep.mubr.msk.f32.mxu0 %vm71_vm0, %v1076_v56  ;;  %4765 = vmatprep.subr.bf16.mxu1 %v5080_v28  ;;  %v5280_v56 = vsub.s32 %v1641_v52, %v5248_v11 }
 0x18c   :  { %4761 = vmatprep.subr.bf16.mxu0 %v5104_v33  ;;  %v1325_v60 = vpop.permute.xlu0 %1324  ;;  %v1327_v61 = vpop.permute.xlu1 %1326 }
 0x18d   :  { %4592 = vmatmul.mubr.msk.f32.vlgmr.msra.gmra.mrb[12].mxu1 %vm71_vm0, %v995_v55  ;;  %v3603_v55 = vld [vmem:[#allocation3] sm:$0x1] }
 0x18e   :  { %4763 = vmatpush3.bf16.msra.mxu0 %v5104_v33  ;;  %4767 = vmatpush3.bf16.msra.mxu1 %v5080_v28 }
 0x18f   :  { %4613 = vmatprep.mubr.msk.f32.mxu1 %vm71_vm0, %v1159_v57  ;;  %4769 = vmatprep.subr.bf16.mxu1 %v5104_v33 }
 0x190   :  { %4773 = vmatprep.subr.bf16.mxu0 %v5080_v28  ;;  %v1408_v62 = vpop.permute.xlu0 %1407  ;;  %v1491_v63 = vpop.permute.xlu1 %1490  ;;  %3606 = vperm.xlu1 %4945, %v3603_v55  }
 0x191   :  { %4603 = vmatmul.mubr.msk.f32.vlgmr.msra.gmra.mrb[14].mxu0 %vm71_vm0, %v1078_v58 }
 0x192   :  { %4771 = vmatpush3.bf16.msra.mxu1 %v5104_v33  ;;  %4775 = vmatpush3.bf16.msra.mxu0 %v5080_v28 }
 0x193   :  { %4624 = vmatprep.mubr.msk.f32.mxu0 %vm71_vm0, %v5117_v38  ;;  %4781 = vmatprep.subr.bf16.mxu1 %v5080_v28 }
 0x194   :  { %4777 = vmatprep.subr.bf16.mxu0 %v5104_v33  ;;  %v1410_v0 = vpop.permute.xlu0 %1409  ;;  %v1493_v2 = vpop.permute.xlu1 %1492 }
 0x195   :  { %4614 = vmatmul.mubr.msk.f32.vlgmr.msra.gmra.mrb[14].mxu1 %vm71_vm0, %v1161_v59 }
 0x196   :  { %4779 = vmatpush3.bf16.msra.mxu0 %v5104_v33  ;;  %4783 = vmatpush3.bf16.msra.mxu1 %v5080_v28 }
 0x197   :  { %4635 = vmatprep.mubr.msk.f32.mxu1 %vm71_vm0, %v1325_v60  ;;  %4785 = vmatprep.subr.bf16.mxu1 %v5104_v33 }
 0x198   :  { %4789 = vmatprep.subr.bf16.mxu0 %v5080_v28 }
 0x199   :  { %4625 = vmatmul.mubr.msk.f32.vlgmr.msra.gmra.mrb[16].mxu0 %vm71_vm0, %v5125_v41 }
 0x19a   :  { %4787 = vmatpush3.bf16.msra.mxu1 %v5104_v33  ;;  %4791 = vmatpush3.bf16.msra.mxu0 %v5080_v28 }
 0x19b   :  { %4646 = vmatprep.mubr.msk.f32.mxu0 %vm71_vm0, %v1408_v62  ;;  %4793 = vmatprep.subr.bf16.mxu0 %v5104_v33 }
 0x19c   :  { %4797 = vmatprep.subr.bf16.mxu1 %v5080_v28 }
 0x19d   :  { %4636 = vmatmul.mubr.msk.f32.vlgmr.msra.gmra.mrb[16].mxu1 %vm71_vm0, %v1327_v61 }
 0x19e   :  { %4795 = vmatpush3.bf16.msra.mxu0 %v5104_v33  ;;  %4799 = vmatpush3.bf16.msra.mxu1 %v5080_v28 }
 0x19f   :  { %4657 = vmatprep.mubr.msk.f32.mxu1 %vm71_vm0, %v1491_v63  ;;  %4801 = vmatprep.subr.bf16.mxu1 %v5104_v33 }
 0x1a1   :  { %4647 = vmatmul.mubr.msk.f32.vlgmr.msra.gmra.mrb[18].mxu0 %vm71_vm0, %v1410_v0 }
 0x1a2   :  { %4803 = vmatpush3.bf16.msra.mxu1 %v5104_v33  ;;  %2222 = vmatprep.mubr.f32.mxu0 %v5768_v1 }
 0x1a5   :  { %4658 = vmatmul.mubr.msk.f32.vlgmr.msra.gmra.mrb[18].mxu1 %vm71_vm0, %v1493_v2 }
 0x1a6   :  { %2311 = vmatprep.mubr.f32.mxu1 %v5768_v1 }
 0x1ce   :  { %v4494_v3 = vpop.f32.mrb[4].mxu0 }
 0x1cf   :  { %v319_v4 = vpop.f32.mrb[5].mxu0 }
 0x240   :  { %v4505_v8 = vpop.f32.mrb[4].mxu1 }
 0x241   :  { %v402_v9 = vpop.f32.mrb[5].mxu1 }
 0x244   :  { %v4516_v12 = vpop.f32.mrb[6].mxu0 }
 0x245   :  { %v1845_v13 = vcombine.low %v4494_v3, %v4516_v12  ;;  %v1846_v14 = vcombine.high %v4494_v3, %v4516_v12  ;;  %v485_v15 = vpop.f32.mrb[7].mxu0 }
 0x246   :  { %v1573_v17 = vcombine.low %v319_v4, %v485_v15  ;;  %v1574_v18 = vcombine.high %v319_v4, %v485_v15 }
 0x247   :  { %v1853_v28 = vrot.slane %v1845_v13, %v5251_v16  ;;  %v1860_v31 = vrot.slane %v1846_v14, %v5251_v16 }
 0x248   :  { %v4527_v22 = vpop.f32.mrb[6].mxu1  ;;  %v1581_v32 = vrot.slane %v1573_v17, %v5251_v16  ;;  %v1588_v35 = vrot.slane %v1574_v18, %v5251_v16 }
 0x249   :  { %v1861_v23 = vcombine.low %v4505_v8, %v4527_v22  ;;  %v1862_v24 = vcombine.high %v4505_v8, %v4527_v22  ;;  %v568_v25 = vpop.f32.mrb[7].mxu1 }
 0x24a   :  { %v1589_v29 = vcombine.low %v402_v9, %v568_v25  ;;  %v1590_v30 = vcombine.high %v402_v9, %v568_v25 }
 0x24b   :  { %v1869_v33 = vrot.slane %v1861_v23, %v5251_v16  ;;  %v1876_v34 = vrot.slane %v1862_v24, %v5251_v16 }
 0x24c   :  { %v1597_v38 = vrot.slane %v1589_v29, %v5251_v16  ;;  %v1604_v39 = vrot.slane %v1590_v30, %v5251_v16  ;;  %v4538_v40 = vpop.f32.mrb[8].mxu0 }
 0x24d   :  { %v1909_v41 = vcombine.low %v1853_v28, %v1869_v33  ;;  %v1910_v42 = vcombine.high %v1853_v28, %v1869_v33  ;;  %v1925_v43 = vcombine.low %v1860_v31, %v1876_v34  ;;  %v1926_v44 = vcombine.high %v1860_v31, %v1876_v34  ;;  %v651_v45 = vpop.f32.mrb[9].mxu0 }
 0x24e   :  { %v1637_v47 = vcombine.low %v1581_v32, %v1597_v38  ;;  %v1638_v48 = vcombine.high %v1581_v32, %v1597_v38  ;;  %v1653_v49 = vcombine.low %v1588_v35, %v1604_v39  ;;  %v1654_v50 = vcombine.high %v1588_v35, %v1604_v39 }
 0x24f   :  { %v5283_v63 = vrot.slane %v1909_v41, %v5280_v56  ;;  %v5286_v0 = vrot.slane %v1910_v42, %v5280_v56  ;;  %v5289_v2 = vrot.slane %v1925_v43, %v5280_v56  ;;  %v5292_v3 = vrot.slane %v1926_v44, %v5280_v56 }
 0x250   :  { %v4549_v53 = vpop.f32.mrb[8].mxu1  ;;  %v5295_v5 = vrot.slane %v1637_v47, %v5280_v56  ;;  %v5298_v6 = vrot.slane %v1638_v48, %v5280_v56  ;;  %v5301_v10 = vrot.slane %v1653_v49, %v5280_v56  ;;  %v5304_v12 = vrot.slane %v1654_v50, %v5280_v56 }
 0x251   :  { %v734_v54 = vpop.f32.mrb[9].mxu1 }
 0x254   :  { %v4560_v57 = vpop.f32.mrb[10].mxu0 }
 0x255   :  { %v1877_v58 = vcombine.low %v4538_v40, %v4560_v57  ;;  %v1878_v59 = vcombine.high %v4538_v40, %v4560_v57  ;;  %v817_v60 = vpop.f32.mrb[11].mxu0 }
 0x256   :  { %v1605_v61 = vcombine.low %v651_v45, %v817_v60  ;;  %v1606_v62 = vcombine.high %v651_v45, %v817_v60 }
 0x257   :  { %v1885_v15 = vrot.slane %v1877_v58, %v5251_v16  ;;  %v1892_v17 = vrot.slane %v1878_v59, %v5251_v16 }
 0x258   :  { %v4571_v4 = vpop.f32.mrb[10].mxu1  ;;  %v1613_v20 = vrot.slane %v1605_v61, %v5251_v16  ;;  %v1620_v21 = vrot.slane %v1606_v62, %v5251_v16 }
 0x259   :  { %v1893_v7 = vcombine.low %v4549_v53, %v4571_v4  ;;  %v1894_v8 = vcombine.high %v4549_v53, %v4571_v4  ;;  %v900_v9 = vpop.f32.mrb[11].mxu1 }
 0x25a   :  { %v1621_v13 = vcombine.low %v734_v54, %v900_v9  ;;  %v1622_v14 = vcombine.high %v734_v54, %v900_v9 }
 0x25b   :  { %v1901_v18 = vrot.slane %v1893_v7, %v5251_v16  ;;  %v1908_v19 = vrot.slane %v1894_v8, %v5251_v16 }
 0x25c   :  { %v1629_v22 = vrot.slane %v1621_v13, %v5251_v16  ;;  %v1636_v23 = vrot.slane %v1622_v14, %v5251_v16  ;;  %v4582_v24 = vpop.f32.mrb[12].mxu0 }
 0x25d   :  { %v1941_v25 = vcombine.low %v1885_v15, %v1901_v18  ;;  %v1942_v26 = vcombine.high %v1885_v15, %v1901_v18  ;;  %v1957_v27 = vcombine.low %v1892_v17, %v1908_v19  ;;  %v1958_v28 = vcombine.high %v1892_v17, %v1908_v19  ;;  %v983_v29 = vpop.f32.mrb[13].mxu0 }
 0x25e   :  { %v1669_v30 = vcombine.low %v1613_v20, %v1629_v22  ;;  %v1670_v31 = vcombine.high %v1613_v20, %v1629_v22  ;;  %v1685_v32 = vcombine.low %v1620_v21, %v1636_v23  ;;  %v1686_v33 = vcombine.high %v1620_v21, %v1636_v23 }
 0x25f   :  { %v5315_v34 = vrot.slane %v1941_v25, %v5280_v56  ;;  %v5318_v35 = vrot.slane %v1942_v26, %v5280_v56  ;;  %v5321_v36 = vrot.slane %v1957_v27, %v5280_v56  ;;  %v5324_v37 = vrot.slane %v1958_v28, %v5280_v56 }
 0x260   :  { %v5327_v38 = vrot.slane %v1669_v30, %v5280_v56  ;;  %v5330_v39 = vrot.slane %v1670_v31, %v5280_v56  ;;  %v5333_v40 = vrot.slane %v1685_v32, %v5280_v56  ;;  %v5336_v41 = vrot.slane %v1686_v33, %v5280_v56  ;;  %v4593_v42 = vpop.f32.mrb[12].mxu1 }
 0x261   :  { %v1066_v43 = vpop.f32.mrb[13].mxu1  ;;  %v1974_v44 = vcombine.high %v5283_v63, %v5315_v34  ;;  %v1976_v45 = vcombine.high %v5286_v0, %v5318_v35  ;;  %v1973_v46 = vcombine.low %v5283_v63, %v5315_v34  ;;  %v1975_v47 = vcombine.low %v5286_v0, %v5318_v35 }
 0x262   :  { %v1702_v48 = vcombine.high %v5295_v5, %v5327_v38  ;;  %v1704_v49 = vcombine.high %v5298_v6, %v5330_v39  ;;  %v1701_v50 = vcombine.low %v5295_v5, %v5327_v38  ;;  %v1703_v51 = vcombine.low %v5298_v6, %v5330_v39 }
 0x263   :  { %v1706_v52 = vcombine.high %v5301_v10, %v5333_v40  ;;  %v1708_v53 = vcombine.high %v5304_v12, %v5336_v41  ;;  %v1705_v54 = vcombine.low %v5301_v10, %v5333_v40  ;;  %v1707_v55 = vcombine.low %v5304_v12, %v5336_v41  ;;  %v5450_v10 = vld [vmem:[%s5761_s3] sm:$0xff] }
 0x264   :  { %v4604_v57 = vpop.f32.mrb[14].mxu0  ;;  %v1978_v58 = vcombine.high %v5289_v2, %v5321_v36  ;;  %v1980_v59 = vcombine.high %v5292_v3, %v5324_v37  ;;  %v1977_v60 = vcombine.low %v5289_v2, %v5321_v36  ;;  %v5770_v35 = vcombine.low %v5292_v3, %v5324_v37  ;;  %v2119_v2 = vld [vmem:[%s5761_s3 + $0x10] sm:$0xff]  ;;  %v2120_v3 = vld [vmem:[%s5761_s3 + $0x18] sm:$0xff]  ;;  %v5552_v36 = vpop.permute.xlu0 %2127 }
 0x265   :  { %v1981_v62 = vcombine.low %v4582_v24, %v4604_v57  ;;  %v1982_v4 = vcombine.high %v4582_v24, %v4604_v57  ;;  %v1149_v7 = vpop.f32.mrb[15].mxu0  ;;  %v5554_v37 = vpop.permute.xlu1 %2132 }
 0x266   :  { %v1709_v8 = vcombine.low %v983_v29, %v1149_v7  ;;  %v1710_v9 = vcombine.high %v983_v29, %v1149_v7 }
 0x267   :  { %v1989_v20 = vrot.slane %v1981_v62, %v5251_v16  ;;  %v1996_v21 = vrot.slane %v1982_v4, %v5251_v16 }
 0x268   :  { %v4615_v13 = vpop.f32.mrb[14].mxu1  ;;  %v1717_v25 = vrot.slane %v1709_v8, %v5251_v16  ;;  %v1724_v24 = vrot.slane %v1710_v9, %v5251_v16 }
 0x269   :  { %v1997_v14 = vcombine.low %v4593_v42, %v4615_v13  ;;  %v1998_v15 = vcombine.high %v4593_v42, %v4615_v13  ;;  %v1232_v17 = vpop.f32.mrb[15].mxu1 }
 0x26a   :  { %v1725_v18 = vcombine.low %v1066_v43, %v1232_v17  ;;  %v1726_v19 = vcombine.high %v1066_v43, %v1232_v17 }
 0x26b   :  { %v2005_v22 = vrot.slane %v1997_v14, %v5251_v16  ;;  %v2012_v23 = vrot.slane %v1998_v15, %v5251_v16 }
 0x26c   :  { %v1733_v26 = vrot.slane %v1725_v18, %v5251_v16  ;;  %v1740_v27 = vrot.slane %v1726_v19, %v5251_v16  ;;  %v4626_v28 = vpop.f32.mrb[16].mxu0 }
 0x26d   :  { %v2045_v29 = vcombine.low %v1989_v20, %v2005_v22  ;;  %v2046_v30 = vcombine.high %v1989_v20, %v2005_v22  ;;  %v2061_v31 = vcombine.low %v1996_v21, %v2012_v23  ;;  %v2062_v32 = vcombine.high %v1996_v21, %v2012_v23  ;;  %v1315_v33 = vpop.f32.mrb[17].mxu0 }
 0x26e   :  { %v1773_v42 = vcombine.low %v1717_v25, %v1733_v26  ;;  %v1774_v43 = vcombine.high %v1717_v25, %v1733_v26  ;;  %v1789_v57 = vcombine.low %v1724_v24, %v1740_v27  ;;  %v1790_v62 = vcombine.high %v1724_v24, %v1740_v27 }
 0x26f   :  { %v5379_v18 = vrot.slane %v2045_v29, %v5280_v56  ;;  %v5382_v19 = vrot.slane %v2046_v30, %v5280_v56  ;;  %v5385_v20 = vrot.slane %v2061_v31, %v5280_v56  ;;  %v5388_v21 = vrot.slane %v2062_v32, %v5280_v56 }
 0x270   :  { %v4637_v4 = vpop.f32.mrb[16].mxu1  ;;  %v1781_v23 = vrot.slane %v1773_v42, %v5280_v56  ;;  %v1788_v25 = vrot.slane %v1774_v43, %v5280_v56  ;;  %v1804_v29 = vrot.slane %v1790_v62, %v5280_v56 }
 0x271   :  { %v1398_v7 = vpop.f32.mrb[17].mxu1 }
 0x274   :  { %v4648_v13 = vpop.f32.mrb[18].mxu0 }
 0x275   :  { %v2013_v8 = vcombine.low %v4626_v28, %v4648_v13  ;;  %v2014_v14 = vcombine.high %v4626_v28, %v4648_v13  ;;  %v1481_v9 = vpop.f32.mrb[19].mxu0  ;;  %v1797_v28 = vrot.slane %v1789_v57, %v5280_v56 }
 0x276   :  { %v1741_v15 = vcombine.low %v1315_v33, %v1481_v9  ;;  %v1742_v17 = vcombine.high %v1315_v33, %v1481_v9 }
 0x277   :  { %v2021_v31 = vrot.slane %v2013_v8, %v5251_v16  ;;  %v2028_v13 = vrot.slane %v2014_v14, %v5251_v16 }
 0x278   :  { %v4659_v22 = vpop.f32.mrb[18].mxu1  ;;  %v1749_v42 = vrot.slane %v1741_v15, %v5251_v16  ;;  %v1756_v43 = vrot.slane %v1742_v17, %v5251_v16 }
 0x279   :  { %v2029_v24 = vcombine.low %v4637_v4, %v4659_v22  ;;  %v2030_v26 = vcombine.high %v4637_v4, %v4659_v22  ;;  %v1564_v27 = vpop.f32.mrb[19].mxu1 }
 0x27a   :  { %v1757_v30 = vcombine.low %v1398_v7, %v1564_v27  ;;  %v1758_v33 = vcombine.high %v1398_v7, %v1564_v27 }
 0x27b   :  { %v2037_v32 = vrot.slane %v2029_v24, %v5251_v16  ;;  %v2044_v9 = vrot.slane %v2030_v26, %v5251_v16 }
 0x27c   :  { %v1765_v4 = vrot.slane %v1757_v30, %v5251_v16  ;;  %v1772_v57 = vrot.slane %v1758_v33, %v5251_v16 }
 0x27d   :  { %v2077_v22 = vcombine.low %v2021_v31, %v2037_v32  ;;  %v2078_v62 = vcombine.high %v2021_v31, %v2037_v32  ;;  %v2093_v1 = vcombine.low %v2028_v13, %v2044_v9  ;;  %v2094_v7 = vcombine.high %v2028_v13, %v2044_v9 }
 0x27e   :  { %v1805_v27 = vcombine.low %v1749_v42, %v1765_v4  ;;  %v1806_v8 = vcombine.high %v1749_v42, %v1765_v4  ;;  %v1821_v61 = vcombine.low %v1756_v43, %v1772_v57  ;;  %v1822_v14 = vcombine.high %v1756_v43, %v1772_v57 }
 0x27f   :  { %v2085_v24 = vrot.slane %v2077_v22, %v5280_v56  ;;  %v2092_v26 = vrot.slane %v2078_v62, %v5280_v56  ;;  %v2101_v15 = vrot.slane %v2093_v1, %v5280_v56  ;;  %v2108_v17 = vrot.slane %v2094_v7, %v5280_v56 }
 0x280   :  { %v1813_v30 = vrot.slane %v1805_v27, %v5280_v56  ;;  %v1820_v16 = vrot.slane %v1806_v8, %v5280_v56  ;;  %v1829_v33 = vrot.slane %v1821_v61, %v5280_v56  ;;  %v1836_v31 = vrot.slane %v1822_v14, %v5280_v56 }
 0x281   :  { %v2110_v13 = vcombine.high %v5379_v18, %v2085_v24  ;;  %v2112_v32 = vcombine.high %v5382_v19, %v2092_v26  ;;  %v2109_v9 = vcombine.low %v5379_v18, %v2085_v24  ;;  %v2111_v42 = vcombine.low %v5382_v19, %v2092_v26 }
 0x282   :  { %v1838_v43 = vcombine.high %v1781_v23, %v1813_v30  ;;  %v1840_v1 = vcombine.high %v1788_v25, %v1820_v16  ;;  %v1837_v4 = vcombine.low %v1781_v23, %v1813_v30  ;;  %v1839_v57 = vcombine.low %v1788_v25, %v1820_v16  ;;  %v5564_v16 = vpop.permute.xlu1 %2137 }
 0x283   :  { %v1842_v22 = vcombine.high %v1797_v28, %v1829_v33  ;;  %v1844_v62 = vcombine.high %v1804_v29, %v1836_v31  ;;  %v1841_v7 = vcombine.low %v1797_v28, %v1829_v33  ;;  %v1843_v27 = vcombine.low %v1804_v29, %v1836_v31 }
 0x284   :  { %v4804_v56 = vpack.c.bf16 %v1838_v43, %v1702_v48  ;;  %v4808_v61 = vpack.c.bf16 %v1840_v1, %v1704_v49  ;;  %v4806_v18 = vpack.c.bf16 %v1837_v4, %v1701_v50  ;;  %v4810_v19 = vpack.c.bf16 %v1839_v57, %v1703_v51 }
 0x285   :  { %v4812_v23 = vpack.c.bf16 %v1842_v22, %v1706_v52  ;;  %v4816_v48 = vpack.c.bf16 %v1844_v62, %v1708_v53  ;;  %v4814_v49 = vpack.c.bf16 %v1841_v7, %v1705_v54  ;;  %v4818_v5 = vpack.c.bf16 %v1843_v27, %v1707_v55  ;;  %v5566_v7 = vpop.permute.xlu0 %2142 }
 0x286   :  { %4805 = vmatprep.subr.bf16.mxu0 %v4804_v56  ;;  %4809 = vmatprep.subr.bf16.mxu1 %v4808_v61  ;;  %v4820_v6 = vpack.c.bf16 %v2110_v13, %v1974_v44  ;;  %v4824_v38 = vpack.c.bf16 %v2112_v32, %v1976_v45  ;;  %v4822_v39 = vpack.c.bf16 %v2109_v9, %v1973_v46  ;;  %v5771_v50 = vmov 0.0  }
 0x287   :  { %4807 = vmatpush1.bf16.msra.mxu0 %v4806_v18  ;;  %4811 = vmatpush1.bf16.msra.mxu1 %v4810_v19  ;;  %v4826_v12 = vpack.c.bf16 %v2111_v42, %v1975_v47  ;;  %v2114_v40 = vcombine.high %v5385_v20, %v2101_v15  ;;  %v2116_v41 = vcombine.high %v5388_v21, %v2108_v17  ;;  %v2118_v47 = vld [vmem:[%s5761_s3 + $0x8] sm:$0xff] }
 0x288   :  { %4813 = vmatprep.subr.bf16.mxu0 %v4812_v23  ;;  %4817 = vmatprep.subr.bf16.mxu1 %v4816_v48  ;;  %v2113_v63 = vcombine.low %v5385_v20, %v2101_v15  ;;  %v2115_v34 = vcombine.low %v5388_v21, %v2108_v17 }
 0x289   :  { %v4828_v44 = vpack.c.bf16 %v2114_v40, %v1978_v58  ;;  %v4832_v45 = vpack.c.bf16 %v2116_v41, %v1980_v59 }
 0x28a   :  { %4332 = vmatmul.mubr.msk.f32.vlgmr.msra.gmra.mrb[20].mxu0 %vm2145_vm1, %v5450_v10  ;;  %4336 = vmatmul.mubr.msk.f32.vlgmr.msra.gmra.mrb[20].mxu1 %vm2145_vm1, %v5450_v10  ;;  %v4830_v0 = vpack.c.bf16 %v2113_v63, %v1977_v60  ;;  %v4834_v46 = vpack.c.bf16 %v2115_v34, %v5770_v35 }
 0x28b   :  { %4815 = vmatpush1.bf16.msra.mxu0 %v4814_v49  ;;  %4819 = vmatpush1.bf16.msra.mxu1 %v4818_v5 }
 0x28c   :  { %4821 = vmatprep.subr.bf16.mxu0 %v4820_v6  ;;  %4825 = vmatprep.subr.bf16.mxu1 %v4824_v38 }
 0x28d   :  { %2228 = vmatprep.mubr.f32.mxu0 %v5771_v50  ;;  %2317 = vmatprep.mubr.f32.mxu1 %v5771_v50 }
 0x28e   :  { %4333 = vmatmul.mubr.msk.f32.gmra.mrb[22].mxu0 %vm2145_vm1, %v2118_v47  ;;  %4337 = vmatmul.mubr.msk.f32.gmra.mrb[22].mxu1 %vm2145_vm1, %v2118_v47 }
 0x28f   :  { %2234 = vmatprep.mubr.f32.mxu0 %v5771_v50  ;;  %2323 = vmatprep.mubr.f32.mxu1 %v5771_v50 }
 0x292   :  { %4334 = vmatmul.mubr.msk.f32.gmra.mrb[24].mxu0 %vm2145_vm1, %v2119_v2  ;;  %4338 = vmatmul.mubr.msk.f32.gmra.mrb[24].mxu1 %vm2145_vm1, %v2119_v2 }
 0x293   :  { %2240 = vmatprep.mubr.f32.mxu0 %v5771_v50  ;;  %2329 = vmatprep.mubr.f32.mxu1 %v5771_v50 }
 0x296   :  { %4335 = vmatmul.mubr.msk.f32.gmra.mrb[26].mxu0 %vm2145_vm1, %v2120_v3  ;;  %4339 = vmatmul.mubr.msk.f32.gmra.mrb[26].mxu1 %vm2145_vm1, %v2120_v3 }
 0x297   :  { %2400 = vmatprep.mubr.f32.mxu0 %v5771_v50  ;;  %2489 = vmatprep.mubr.f32.mxu1 %v5771_v50 }
 0x29a   :  { %4340 = vmatmul.mubr.msk.f32.vlgmr.msra.gmra.mrb[28].mxu0 %vm2145_vm1, %v5450_v10  ;;  %4344 = vmatmul.mubr.msk.f32.vlgmr.msra.gmra.mrb[28].mxu1 %vm2145_vm1, %v5450_v10 }
 0x29b   :  { %4823 = vmatpush1.bf16.msra.mxu0 %v4822_v39  ;;  %4827 = vmatpush1.bf16.msra.mxu1 %v4826_v12 }
 0x29c   :  { %4829 = vmatprep.subr.bf16.mxu0 %v4828_v44  ;;  %4833 = vmatprep.subr.bf16.mxu1 %v4832_v45 }
 0x29d   :  { %2406 = vmatprep.mubr.f32.mxu0 %v5771_v50  ;;  %2495 = vmatprep.mubr.f32.mxu1 %v5771_v50 }
 0x29e   :  { %4341 = vmatmul.mubr.msk.f32.gmra.mrb[30].mxu0 %vm2145_vm1, %v2118_v47  ;;  %4345 = vmatmul.mubr.msk.f32.gmra.mrb[30].mxu1 %vm2145_vm1, %v2118_v47 }
 0x29f   :  { %2412 = vmatprep.mubr.f32.mxu0 %v5771_v50  ;;  %2501 = vmatprep.mubr.f32.mxu1 %v5771_v50 }
 0x2a2   :  { %4342 = vmatmul.mubr.msk.f32.gmra.mrb[32].mxu0 %vm2145_vm1, %v2119_v2  ;;  %4346 = vmatmul.mubr.msk.f32.gmra.mrb[32].mxu1 %vm2145_vm1, %v2119_v2 }
 0x2a3   :  { %2418 = vmatprep.mubr.f32.mxu0 %v5771_v50  ;;  %2507 = vmatprep.mubr.f32.mxu1 %v5771_v50 }
 0x2a6   :  { %4343 = vmatmul.mubr.msk.f32.gmra.mrb[34].mxu0 %vm2145_vm1, %v2120_v3  ;;  %4347 = vmatmul.mubr.msk.f32.gmra.mrb[34].mxu1 %vm2145_vm1, %v2120_v3 }
 0x2a7   :  { %2578 = vmatprep.mubr.f32.mxu0 %v5771_v50  ;;  %2667 = vmatprep.mubr.f32.mxu1 %v5771_v50 }
 0x2aa   :  { %4348 = vmatmul.mubr.msk.f32.vlgmr.msra.gmra.mrb[36].mxu0 %vm2145_vm1, %v5450_v10  ;;  %4352 = vmatmul.mubr.msk.f32.vlgmr.msra.gmra.mrb[36].mxu1 %vm2145_vm1, %v5450_v10 }
 0x2ab   :  { %4831 = vmatpush1.bf16.msra.mxu0 %v4830_v0  ;;  %4835 = vmatpush1.bf16.msra.mxu1 %v4834_v46 }
 0x2ac   :  { %2584 = vmatprep.mubr.f32.mxu0 %v5771_v50  ;;  %2673 = vmatprep.mubr.f32.mxu1 %v5771_v50 }
 0x2ae   :  { %4349 = vmatmul.mubr.msk.f32.gmra.mrb[38].mxu0 %vm2145_vm1, %v2118_v47  ;;  %4353 = vmatmul.mubr.msk.f32.gmra.mrb[38].mxu1 %vm2145_vm1, %v2118_v47 }
 0x2af   :  { %2590 = vmatprep.mubr.f32.mxu0 %v5771_v50  ;;  %2679 = vmatprep.mubr.f32.mxu1 %v5771_v50 }
 0x2b2   :  { %4350 = vmatmul.mubr.msk.f32.gmra.mrb[40].mxu0 %vm2145_vm1, %v2119_v2  ;;  %4354 = vmatmul.mubr.msk.f32.gmra.mrb[40].mxu1 %vm2145_vm1, %v2119_v2 }
 0x2b3   :  { %2596 = vmatprep.mubr.f32.mxu0 %v5771_v50  ;;  %2685 = vmatprep.mubr.f32.mxu1 %v5771_v50 }
 0x2b6   :  { %4351 = vmatmul.mubr.msk.f32.gmra.mrb[42].mxu0 %vm2145_vm1, %v2120_v3  ;;  %4355 = vmatmul.mubr.msk.f32.gmra.mrb[42].mxu1 %vm2145_vm1, %v2120_v3 }
 0x2b7   :  { %2756 = vmatprep.mubr.f32.mxu0 %v5771_v50  ;;  %2845 = vmatprep.mubr.f32.mxu1 %v5771_v50 }
 0x2ba   :  { %4356 = vmatmul.mubr.msk.f32.vlgmr.msra.gmra.mrb[44].mxu0 %vm2145_vm1, %v5450_v10  ;;  %4360 = vmatmul.mubr.msk.f32.vlgmr.msra.gmra.mrb[44].mxu1 %vm2145_vm1, %v5450_v10 }
 0x2bb   :  { %2762 = vmatprep.mubr.f32.mxu0 %v5771_v50  ;;  %2851 = vmatprep.mubr.f32.mxu1 %v5771_v50 }
 0x2be   :  { %4357 = vmatmul.mubr.msk.f32.gmra.mrb[46].mxu0 %vm2145_vm1, %v2118_v47  ;;  %4361 = vmatmul.mubr.msk.f32.gmra.mrb[46].mxu1 %vm2145_vm1, %v2118_v47 }
 0x2bf   :  { %2768 = vmatprep.mubr.f32.mxu0 %v5771_v50  ;;  %2857 = vmatprep.mubr.f32.mxu1 %v5771_v50 }
 0x2c2   :  { %4358 = vmatmul.mubr.msk.f32.gmra.mrb[48].mxu0 %vm2145_vm1, %v2119_v2  ;;  %4362 = vmatmul.mubr.msk.f32.gmra.mrb[48].mxu1 %vm2145_vm1, %v2119_v2 }
 0x2c3   :  { %2774 = vmatprep.mubr.f32.mxu0 %v5771_v50  ;;  %2863 = vmatprep.mubr.f32.mxu1 %v5771_v50 }
 0x2c6   :  { %4359 = vmatmul.mubr.msk.f32.gmra.mrb[50].mxu0 %vm2145_vm1, %v2120_v3  ;;  %4363 = vmatmul.mubr.msk.f32.gmra.mrb[50].mxu1 %vm2145_vm1, %v2120_v3 }
 0x2c7   :  { %3018 = vmatprep.mubr.f32.mxu0 %v5771_v50  ;;  %3095 = vmatprep.mubr.f32.mxu1 %v5771_v50 }
 0x35d   :  { %v2224_v51 = vpop.f32.mrb[20].mxu0  ;;  %v2313_v52 = vpop.f32.mrb[20].mxu1 }
 0x35e   :  { %v2226_v53 = vpop.f32.mrb[21].mxu0  ;;  %v2315_v54 = vpop.f32.mrb[21].mxu1  ;;  %v2225_v55 = vadd.f32 %v2224_v51, %v5552_v36  ;;  %v2314_v58 = vadd.f32 %v2313_v52, %v5552_v36 }
 0x35f   :  { %v2227_v59 = vadd.f32 %v2226_v53, %v5552_v36  ;;  %v2316_v60 = vadd.f32 %v2315_v54, %v5552_v36 }
 0x360   :  { %v2870_v26 = vmax.f32 %v2225_v55, 0.0  ;;  %v2872_v15 = vmax.f32 %v2314_v58, 0.0 }
 0x361   :  { %v2230_v20 = vpop.f32.mrb[22].mxu0  ;;  %v2319_v21 = vpop.f32.mrb[22].mxu1  ;;  %v2871_v33 = vmax.f32 %v2227_v59, 0.0  ;;  %v2873_v31 = vmax.f32 %v2316_v60, 0.0 }
 0x362   :  { %v2231_v25 = vadd.f32 %v2230_v20, %v5554_v37  ;;  %v2320_v28 = vadd.f32 %v2319_v21, %v5554_v37  ;;  %v2232_v29 = vpop.f32.mrb[23].mxu0  ;;  %v2321_v8 = vpop.f32.mrb[23].mxu1 }
 0x363   :  { %v2233_v14 = vadd.f32 %v2232_v29, %v5554_v37  ;;  %v2322_v24 = vadd.f32 %v2321_v8, %v5554_v37  ;;  %v5585_v29 = vld [vmem:[%s5763_s5] sm:$0xff] }
 0x364   :  { %v2886_v17 = vmax.f32 %v2231_v25, 0.0  ;;  %v2888_v30 = vmax.f32 %v2320_v28, 0.0 }
 0x365   :  { %v2887_v13 = vmax.f32 %v2233_v14, 0.0  ;;  %v2889_v32 = vmax.f32 %v2322_v24, 0.0  ;;  %v2236_v9 = vpop.f32.mrb[24].mxu0  ;;  %v2325_v42 = vpop.f32.mrb[24].mxu1 }
 0x366   :  { %v4838_v43 = vpack.c.bf16 %v2886_v17, %v2870_v26  ;;  %v4846_v1 = vpack.c.bf16 %v2888_v30, %v2872_v15  ;;  %v2238_v4 = vpop.f32.mrb[25].mxu0  ;;  %v2327_v57 = vpop.f32.mrb[25].mxu1  ;;  %v2237_v27 = vadd.f32 %v2236_v9, %v5564_v16  ;;  %v2326_v56 = vadd.f32 %v2325_v42, %v5564_v16 }
 0x367   :  { %v4836_v22 = vpack.c.bf16 %v2887_v13, %v2871_v33  ;;  %v4844_v62 = vpack.c.bf16 %v2889_v32, %v2873_v31  ;;  %v2239_v61 = vadd.f32 %v2238_v4, %v5564_v16  ;;  %v2328_v18 = vadd.f32 %v2327_v57, %v5564_v16  ;;  %v5597_v57 = vld [vmem:[%s5763_s5 + $0x8] sm:$0xff] }
 0x368   :  { %v2902_v10 = vmax.f32 %v2237_v27, 0.0  ;;  %v2904_v12 = vmax.f32 %v2326_v56, 0.0 }
 0x369   :  { %v2242_v19 = vpop.f32.mrb[26].mxu0  ;;  %v2331_v23 = vpop.f32.mrb[26].mxu1  ;;  %4837 = vmatprep.subr.bf16.mxu0 %v4836_v22  ;;  %4845 = vmatprep.subr.bf16.mxu1 %v4844_v62  ;;  %v2903_v63 = vmax.f32 %v2239_v61, 0.0  ;;  %v2905_v34 = vmax.f32 %v2328_v18, 0.0 }
 0x36a   :  { %v2243_v48 = vadd.f32 %v2242_v19, %v5566_v7  ;;  %v2332_v49 = vadd.f32 %v2331_v23, %v5566_v7  ;;  %v2244_v5 = vpop.f32.mrb[27].mxu0  ;;  %v2333_v6 = vpop.f32.mrb[27].mxu1  ;;  %4839 = vmatpush1.bf16.msra.mxu0 %v4838_v43  ;;  %4847 = vmatpush1.bf16.msra.mxu1 %v4846_v1 }
 0x36b   :  { %v2245_v38 = vadd.f32 %v2244_v5, %v5566_v7  ;;  %v2334_v39 = vadd.f32 %v2333_v6, %v5566_v7 }
 0x36c   :  { %v2918_v40 = vmax.f32 %v2243_v48, 0.0  ;;  %v2920_v41 = vmax.f32 %v2332_v49, 0.0 }
 0x36d   :  { %v2919_v44 = vmax.f32 %v2245_v38, 0.0  ;;  %v2921_v45 = vmax.f32 %v2334_v39, 0.0  ;;  %v2402_v0 = vpop.f32.mrb[28].mxu0  ;;  %v2491_v35 = vpop.f32.mrb[28].mxu1 }
 0x36e   :  { %v4842_v46 = vpack.c.bf16 %v2918_v40, %v2902_v10  ;;  %v4850_v47 = vpack.c.bf16 %v2920_v41, %v2904_v12  ;;  %v2404_v2 = vpop.f32.mrb[29].mxu0  ;;  %v2493_v3 = vpop.f32.mrb[29].mxu1  ;;  %v2403_v53 = vadd.f32 %v2402_v0, %v5552_v36  ;;  %v2492_v54 = vadd.f32 %v2491_v35, %v5552_v36 }
 0x36f   :  { %v4840_v51 = vpack.c.bf16 %v2919_v44, %v2903_v63  ;;  %v4848_v52 = vpack.c.bf16 %v2921_v45, %v2905_v34  ;;  %v2405_v55 = vadd.f32 %v2404_v2, %v5552_v36  ;;  %v2494_v58 = vadd.f32 %v2493_v3, %v5552_v36 }
 0x370   :  { %v2874_v24 = vmax.f32 %v2403_v53, 0.0  ;;  %v2876_v26 = vmax.f32 %v2492_v54, 0.0 }
 0x371   :  { %v2408_v59 = vpop.f32.mrb[30].mxu0  ;;  %v2497_v60 = vpop.f32.mrb[30].mxu1  ;;  %4841 = vmatprep.subr.bf16.mxu0 %v4840_v51  ;;  %4849 = vmatprep.subr.bf16.mxu1 %v4848_v52  ;;  %v2875_v30 = vmax.f32 %v2405_v55, 0.0  ;;  %v2877_v33 = vmax.f32 %v2494_v58, 0.0 }
 0x372   :  { %v2409_v20 = vadd.f32 %v2408_v59, %v5554_v37  ;;  %v2498_v21 = vadd.f32 %v2497_v60, %v5554_v37  ;;  %v2410_v25 = vpop.f32.mrb[31].mxu0  ;;  %v2499_v28 = vpop.f32.mrb[31].mxu1  ;;  %4843 = vmatpush1.bf16.msra.mxu0 %v4842_v46  ;;  %4851 = vmatpush1.bf16.msra.mxu1 %v4850_v47 }
 0x373   :  { %v2411_v8 = vadd.f32 %v2410_v25, %v5554_v37  ;;  %v2500_v14 = vadd.f32 %v2499_v28, %v5554_v37 }
 0x374   :  { %v2890_v15 = vmax.f32 %v2409_v20, 0.0  ;;  %v2892_v17 = vmax.f32 %v2498_v21, 0.0 }
 0x375   :  { %v2891_v31 = vmax.f32 %v2411_v8, 0.0  ;;  %v2893_v13 = vmax.f32 %v2500_v14, 0.0  ;;  %v2414_v32 = vpop.f32.mrb[32].mxu0  ;;  %v2503_v9 = vpop.f32.mrb[32].mxu1  ;;  %4364 = vmatmul.mubr.msk.f32.vlgmr.msra.gmra.mrb[52].mxu0 %vm71_vm0, %v5585_v29  ;;  %4366 = vmatmul.mubr.msk.f32.vlgmr.msra.gmra.mrb[52].mxu1 %vm71_vm0, %v5585_v29 }
 0x376   :  { %v4854_v42 = vpack.c.bf16 %v2890_v15, %v2874_v24  ;;  %v4862_v43 = vpack.c.bf16 %v2892_v17, %v2876_v26  ;;  %v2416_v1 = vpop.f32.mrb[33].mxu0  ;;  %v2505_v4 = vpop.f32.mrb[33].mxu1  ;;  %3024 = vmatprep.mubr.f32.mxu0 %v5771_v50  ;;  %3101 = vmatprep.mubr.f32.mxu1 %v5771_v50  ;;  %v2415_v27 = vadd.f32 %v2414_v32, %v5564_v16 }
 0x377   :  { %v4852_v22 = vpack.c.bf16 %v2891_v31, %v2875_v30  ;;  %v4860_v62 = vpack.c.bf16 %v2893_v13, %v2877_v33  ;;  %v2504_v56 = vadd.f32 %v2503_v9, %v5564_v16  ;;  %v2417_v61 = vadd.f32 %v2416_v1, %v5564_v16 }
 0x378   :  { %v2506_v18 = vadd.f32 %v2505_v4, %v5564_v16  ;;  %v2906_v10 = vmax.f32 %v2415_v27, 0.0 }
 0x379   :  { %v2420_v19 = vpop.f32.mrb[34].mxu0  ;;  %v2509_v23 = vpop.f32.mrb[34].mxu1  ;;  %4365 = vmatmul.mubr.msk.f32.gmra.mrb[54].mxu0 %vm71_vm0, %v5597_v57  ;;  %4367 = vmatmul.mubr.msk.f32.gmra.mrb[54].mxu1 %vm71_vm0, %v5597_v57  ;;  %v2908_v12 = vmax.f32 %v2504_v56, 0.0  ;;  %v2907_v63 = vmax.f32 %v2417_v61, 0.0 }
 0x37a   :  { %v2421_v48 = vadd.f32 %v2420_v19, %v5566_v7  ;;  %v2510_v49 = vadd.f32 %v2509_v23, %v5566_v7  ;;  %4853 = vmatprep.subr.bf16.mxu0 %v4852_v22  ;;  %4861 = vmatprep.subr.bf16.mxu1 %v4860_v62  ;;  %v2422_v5 = vpop.f32.mrb[35].mxu0  ;;  %v2511_v6 = vpop.f32.mrb[35].mxu1  ;;  %v2909_v34 = vmax.f32 %v2506_v18, 0.0 }
 0x37b   :  { %v2423_v38 = vadd.f32 %v2422_v5, %v5566_v7  ;;  %v2512_v39 = vadd.f32 %v2511_v6, %v5566_v7  ;;  %4855 = vmatpush1.bf16.msra.mxu0 %v4854_v42  ;;  %4863 = vmatpush1.bf16.msra.mxu1 %v4862_v43 }
 0x37c   :  { %v2922_v40 = vmax.f32 %v2421_v48, 0.0  ;;  %v2924_v41 = vmax.f32 %v2510_v49, 0.0  ;;  %3172 = vmatprep.mubr.f32.mxu0 %v5771_v50  ;;  %3249 = vmatprep.mubr.f32.mxu1 %v5771_v50 }
 0x37d   :  { %v2923_v44 = vmax.f32 %v2423_v38, 0.0  ;;  %v2925_v45 = vmax.f32 %v2512_v39, 0.0  ;;  %v2580_v0 = vpop.f32.mrb[36].mxu0  ;;  %v2669_v35 = vpop.f32.mrb[36].mxu1 }
 0x37e   :  { %v4858_v46 = vpack.c.bf16 %v2922_v40, %v2906_v10  ;;  %v4866_v47 = vpack.c.bf16 %v2924_v41, %v2908_v12  ;;  %v2582_v2 = vpop.f32.mrb[37].mxu0  ;;  %v2671_v3 = vpop.f32.mrb[37].mxu1  ;;  %v2581_v53 = vadd.f32 %v2580_v0, %v5552_v36  ;;  %v2670_v54 = vadd.f32 %v2669_v35, %v5552_v36 }
 0x37f   :  { %v4856_v51 = vpack.c.bf16 %v2923_v44, %v2907_v63  ;;  %v4864_v52 = vpack.c.bf16 %v2925_v45, %v2909_v34  ;;  %v2583_v55 = vadd.f32 %v2582_v2, %v5552_v36  ;;  %v2672_v58 = vadd.f32 %v2671_v3, %v5552_v36 }
 0x380   :  { %v2878_v24 = vmax.f32 %v2581_v53, 0.0  ;;  %v2880_v26 = vmax.f32 %v2670_v54, 0.0 }
 0x381   :  { %v2586_v59 = vpop.f32.mrb[38].mxu0  ;;  %v2675_v60 = vpop.f32.mrb[38].mxu1  ;;  %4857 = vmatprep.subr.bf16.mxu0 %v4856_v51  ;;  %4865 = vmatprep.subr.bf16.mxu1 %v4864_v52  ;;  %v2879_v30 = vmax.f32 %v2583_v55, 0.0  ;;  %v2881_v33 = vmax.f32 %v2672_v58, 0.0 }
 0x382   :  { %v2587_v20 = vadd.f32 %v2586_v59, %v5554_v37  ;;  %v2676_v21 = vadd.f32 %v2675_v60, %v5554_v37  ;;  %v2588_v25 = vpop.f32.mrb[39].mxu0  ;;  %v2677_v28 = vpop.f32.mrb[39].mxu1  ;;  %4859 = vmatpush1.bf16.msra.mxu0 %v4858_v46  ;;  %4867 = vmatpush1.bf16.msra.mxu1 %v4866_v47 }
 0x383   :  { %v2589_v8 = vadd.f32 %v2588_v25, %v5554_v37  ;;  %v2678_v14 = vadd.f32 %v2677_v28, %v5554_v37 }
 0x384   :  { %v2894_v15 = vmax.f32 %v2587_v20, 0.0  ;;  %v2896_v17 = vmax.f32 %v2676_v21, 0.0 }
 0x385   :  { %v2895_v31 = vmax.f32 %v2589_v8, 0.0  ;;  %v2897_v13 = vmax.f32 %v2678_v14, 0.0  ;;  %v2592_v32 = vpop.f32.mrb[40].mxu0  ;;  %v2681_v9 = vpop.f32.mrb[40].mxu1  ;;  %4368 = vmatmul.mubr.msk.f32.vlgmr.msra.gmra.mrb[56].mxu0 %vm71_vm0, %v5585_v29  ;;  %4370 = vmatmul.mubr.msk.f32.vlgmr.msra.gmra.mrb[56].mxu1 %vm71_vm0, %v5585_v29 }
 0x386   :  { %v4870_v42 = vpack.c.bf16 %v2894_v15, %v2878_v24  ;;  %v4878_v43 = vpack.c.bf16 %v2896_v17, %v2880_v26  ;;  %v2594_v1 = vpop.f32.mrb[41].mxu0  ;;  %v2683_v4 = vpop.f32.mrb[41].mxu1  ;;  %3178 = vmatprep.mubr.f32.mxu0 %v5771_v50  ;;  %3255 = vmatprep.mubr.f32.mxu1 %v5771_v50  ;;  %v2593_v27 = vadd.f32 %v2592_v32, %v5564_v16 }
 0x387   :  { %v4868_v22 = vpack.c.bf16 %v2895_v31, %v2879_v30  ;;  %v4876_v62 = vpack.c.bf16 %v2897_v13, %v2881_v33  ;;  %v2682_v56 = vadd.f32 %v2681_v9, %v5564_v16  ;;  %v2595_v61 = vadd.f32 %v2594_v1, %v5564_v16 }
 0x388   :  { %v2684_v18 = vadd.f32 %v2683_v4, %v5564_v16  ;;  %v2910_v10 = vmax.f32 %v2593_v27, 0.0 }
 0x389   :  { %v2598_v19 = vpop.f32.mrb[42].mxu0  ;;  %v2687_v23 = vpop.f32.mrb[42].mxu1  ;;  %4369 = vmatmul.mubr.msk.f32.gmra.mrb[58].mxu0 %vm71_vm0, %v5597_v57  ;;  %4371 = vmatmul.mubr.msk.f32.gmra.mrb[58].mxu1 %vm71_vm0, %v5597_v57  ;;  %v2912_v12 = vmax.f32 %v2682_v56, 0.0  ;;  %v2911_v63 = vmax.f32 %v2595_v61, 0.0 }
 0x38a   :  { %v2599_v48 = vadd.f32 %v2598_v19, %v5566_v7  ;;  %v2688_v49 = vadd.f32 %v2687_v23, %v5566_v7  ;;  %4869 = vmatprep.subr.bf16.mxu0 %v4868_v22  ;;  %4877 = vmatprep.subr.bf16.mxu1 %v4876_v62  ;;  %v2600_v5 = vpop.f32.mrb[43].mxu0  ;;  %v2689_v6 = vpop.f32.mrb[43].mxu1  ;;  %v2913_v34 = vmax.f32 %v2684_v18, 0.0 }
 0x38b   :  { %v2601_v38 = vadd.f32 %v2600_v5, %v5566_v7  ;;  %v2690_v39 = vadd.f32 %v2689_v6, %v5566_v7  ;;  %4871 = vmatpush1.bf16.msra.mxu0 %v4870_v42  ;;  %4879 = vmatpush1.bf16.msra.mxu1 %v4878_v43 }
 0x38c   :  { %v2926_v40 = vmax.f32 %v2599_v48, 0.0  ;;  %v2928_v41 = vmax.f32 %v2688_v49, 0.0  ;;  %3326 = vmatprep.mubr.f32.mxu0 %v5771_v50  ;;  %3403 = vmatprep.mubr.f32.mxu1 %v5771_v50 }
 0x38d   :  { %v2927_v44 = vmax.f32 %v2601_v38, 0.0  ;;  %v2929_v45 = vmax.f32 %v2690_v39, 0.0  ;;  %v2758_v0 = vpop.f32.mrb[44].mxu0  ;;  %v2847_v35 = vpop.f32.mrb[44].mxu1 }
 0x38e   :  { %v4874_v46 = vpack.c.bf16 %v2926_v40, %v2910_v10  ;;  %v4882_v47 = vpack.c.bf16 %v2928_v41, %v2912_v12  ;;  %v2760_v2 = vpop.f32.mrb[45].mxu0  ;;  %v2849_v3 = vpop.f32.mrb[45].mxu1  ;;  %v2759_v53 = vadd.f32 %v2758_v0, %v5552_v36  ;;  %v2848_v54 = vadd.f32 %v2847_v35, %v5552_v36 }
 0x38f   :  { %v4872_v51 = vpack.c.bf16 %v2927_v44, %v2911_v63  ;;  %v4880_v52 = vpack.c.bf16 %v2929_v45, %v2913_v34  ;;  %v2761_v55 = vadd.f32 %v2760_v2, %v5552_v36  ;;  %v2850_v58 = vadd.f32 %v2849_v3, %v5552_v36  ;;  %v5682_v2 = vpop.permute.xlu1 %2940 }
 0x390   :  { %v2882_v24 = vmax.f32 %v2759_v53, 0.0  ;;  %v2884_v26 = vmax.f32 %v2848_v54, 0.0 }
 0x391   :  { %v2764_v59 = vpop.f32.mrb[46].mxu0  ;;  %v2853_v60 = vpop.f32.mrb[46].mxu1  ;;  %4873 = vmatprep.subr.bf16.mxu0 %v4872_v51  ;;  %4881 = vmatprep.subr.bf16.mxu1 %v4880_v52  ;;  %v2883_v17 = vmax.f32 %v2761_v55, 0.0  ;;  %v2885_v30 = vmax.f32 %v2850_v58, 0.0 }
 0x392   :  { %v2765_v20 = vadd.f32 %v2764_v59, %v5554_v37  ;;  %v2854_v21 = vadd.f32 %v2853_v60, %v5554_v37  ;;  %v2766_v25 = vpop.f32.mrb[47].mxu0  ;;  %v2855_v28 = vpop.f32.mrb[47].mxu1  ;;  %4875 = vmatpush1.bf16.msra.mxu0 %v4874_v46  ;;  %4883 = vmatpush1.bf16.msra.mxu1 %v4882_v47 }
 0x393   :  { %v2767_v8 = vadd.f32 %v2766_v25, %v5554_v37  ;;  %v2856_v14 = vadd.f32 %v2855_v28, %v5554_v37 }
 0x394   :  { %v2898_v15 = vmax.f32 %v2765_v20, 0.0  ;;  %v2900_v36 = vmax.f32 %v2854_v21, 0.0 }
 0x395   :  { %v2899_v33 = vmax.f32 %v2767_v8, 0.0  ;;  %v2901_v31 = vmax.f32 %v2856_v14, 0.0  ;;  %v2770_v13 = vpop.f32.mrb[48].mxu0  ;;  %v2859_v32 = vpop.f32.mrb[48].mxu1  ;;  %4372 = vmatmul.mubr.msk.f32.vlgmr.msra.gmra.mrb[60].mxu0 %vm71_vm0, %v5585_v29  ;;  %4374 = vmatmul.mubr.msk.f32.vlgmr.msra.gmra.mrb[60].mxu1 %vm71_vm0, %v5585_v29 }
 0x396   :  { %v4886_v9 = vpack.c.bf16 %v2898_v15, %v2882_v24  ;;  %v4894_v42 = vpack.c.bf16 %v2900_v36, %v2884_v26  ;;  %v2772_v43 = vpop.f32.mrb[49].mxu0  ;;  %v2861_v37 = vpop.f32.mrb[49].mxu1  ;;  %3332 = vmatprep.mubr.f32.mxu0 %v5771_v50  ;;  %3409 = vmatprep.mubr.f32.mxu1 %v5771_v50  ;;  %v2771_v22 = vadd.f32 %v2770_v13, %v5564_v16  ;;  %v5697_v13 = vld [vmem:[%s5765_s7] sm:$0x1]  ;;  %s5003_s7 = smov [#allocation7]  }
 0x397   :  { %v4884_v1 = vpack.c.bf16 %v2899_v33, %v2883_v17  ;;  %v4892_v4 = vpack.c.bf16 %v2901_v31, %v2885_v30  ;;  %v2860_v62 = vadd.f32 %v2859_v32, %v5564_v16  ;;  %v2773_v27 = vadd.f32 %v2772_v43, %v5564_v16  ;;  %s4284_s0 = sshll.u32 %s5003_s7, 4  ;;  %s4285_s0 = int_to_ptr.vmem [resolvable:$true] %s4284_s0 }
 0x398   :  { %v2862_v56 = vadd.f32 %v2861_v37, %v5564_v16  ;;  %v2914_v6 = vmax.f32 %v2771_v22, 0.0  ;;  %s4968_s13 = scalar_lea.vmem %s4285_s0, 256  ;;  %p4973_p9 = scmp.lt.s32.totalorder %s4285_s0, %s4285_s0 }
 0x399   :  { %v2776_v61 = vpop.f32.mrb[50].mxu0  ;;  %v2865_v18 = vpop.f32.mrb[50].mxu1  ;;  %4373 = vmatmul.mubr.msk.f32.gmra.mrb[62].mxu0 %vm71_vm0, %v5597_v57  ;;  %4375 = vmatmul.mubr.msk.f32.gmra.mrb[62].mxu1 %vm71_vm0, %v5597_v57  ;;  %v2916_v38 = vmax.f32 %v2860_v62, 0.0  ;;  %v2915_v12 = vmax.f32 %v2773_v27, 0.0  ;;  %p4969_p8 = scmp.ne.s32.totalorder %s4285_s0, %s4968_s13  ;;  %p4974_p10 = scmp.lt.s32.totalorder %s4968_s13, %s4968_s13 }
 0x39a   :  { %v2777_v19 = vadd.f32 %v2776_v61, %v5566_v7  ;;  %v2866_v23 = vadd.f32 %v2865_v18, %v5566_v7  ;;  %4885 = vmatprep.subr.bf16.mxu0 %v4884_v1  ;;  %4893 = vmatprep.subr.bf16.mxu1 %v4892_v4  ;;  %v2778_v48 = vpop.f32.mrb[51].mxu0  ;;  %v2867_v49 = vpop.f32.mrb[51].mxu1  ;;  %v2917_v40 = vmax.f32 %v2862_v56, 0.0 }
 0x39b   :  { %v2779_v5 = vadd.f32 %v2778_v48, %v5566_v7  ;;  %v2868_v16 = vadd.f32 %v2867_v49, %v5566_v7  ;;  %4887 = vmatpush1.bf16.msra.mxu0 %v4886_v9  ;;  %4895 = vmatpush1.bf16.msra.mxu1 %v4894_v42  ;;  %p4975_p11 = por %p4974_p10, %p4973_p9 }
 0x39c   :  { %v2930_v39 = vmax.f32 %v2777_v19, 0.0  ;;  %v2932_v10 = vmax.f32 %v2866_v23, 0.0  ;;  %3480 = vmatprep.mubr.f32.mxu0 %v5771_v50  ;;  %3557 = vmatprep.mubr.f32.mxu1 %v5771_v50 }
 0x39d   :  { %v2931_v41 = vmax.f32 %v2779_v5, 0.0  ;;  %v2933_v63 = vmax.f32 %v2868_v16, 0.0  ;;  %p4976_p12 = pnand %p4975_p11, %p4969_p8 }
 0x39e   :  { %v4890_v34 = vpack.c.bf16 %v2930_v39, %v2914_v6  ;;  %v4898_v44 = vpack.c.bf16 %v2932_v10, %v2916_v38 }
 0x39f   :  { %v4888_v45 = vpack.c.bf16 %v2931_v41, %v2915_v12  ;;  %v4896_v0 = vpack.c.bf16 %v2933_v63, %v2917_v40 }
 0x3a1   :  { %4889 = vmatprep.subr.bf16.mxu0 %v4888_v45  ;;  %4897 = vmatprep.subr.bf16.mxu1 %v4896_v0 }
 0x3a2   :  { %4891 = vmatpush1.bf16.msra.mxu0 %v4890_v34  ;;  %4899 = vmatpush1.bf16.msra.mxu1 %v4898_v44 }
 0x3a5   :  { %4376 = vmatmul.mubr.msk.f32.vlgmr.msra.gmra.mrb[64].mxu0 %vm71_vm0, %v5585_v29  ;;  %4378 = vmatmul.mubr.msk.f32.vlgmr.msra.gmra.mrb[64].mxu1 %vm71_vm0, %v5585_v29  ;;  %v5684_v29 = vpop.permute.xlu0 %2945 }
 0x3a6   :  { %3486 = vmatprep.mubr.f32.mxu0 %v5771_v50  ;;  %3563 = vmatprep.mubr.f32.mxu1 %v5771_v50 }
 0x3a9   :  { %4377 = vmatmul.mubr.msk.f32.gmra.mrb[66].mxu0 %vm71_vm0, %v5597_v57  ;;  %4379 = vmatmul.mubr.msk.f32.gmra.mrb[66].mxu1 %vm71_vm0, %v5597_v57 }
 0x3aa   :  { %3680 = vmatprep.mubr.f32.mxu0 %v5771_v50  ;;  %3751 = vmatprep.mubr.f32.mxu1 %v5771_v50 }
 0x448   :  { %v3020_v7 = vpop.f32.mrb[52].mxu0  ;;  %v3097_v35 = vpop.f32.mrb[52].mxu1 }
 0x449   :  { %v3022_v46 = vpop.f32.mrb[53].mxu0  ;;  %v3099_v47 = vpop.f32.mrb[53].mxu1  ;;  %v3021_v3 = vadd.f32 %v3020_v7, %v5682_v2  ;;  %v3098_v51 = vadd.f32 %v3097_v35, %v5682_v2 }
 0x44a   :  { %v3023_v52 = vadd.f32 %v3022_v46, %v5682_v2  ;;  %v3100_v57 = vadd.f32 %v3099_v47, %v5682_v2 }
 0x44b   :  { %v3570_v25 = vmax.f32 %v3021_v3, 0.0  ;;  %v3572_v28 = vmax.f32 %v3098_v51, 0.0 }
 0x44c   :  { %v3026_v53 = vpop.f32.mrb[54].mxu0  ;;  %v3103_v54 = vpop.f32.mrb[54].mxu1  ;;  %v3571_v24 = vmax.f32 %v3023_v52, 0.0  ;;  %v3573_v26 = vmax.f32 %v3100_v57, 0.0 }
 0x44d   :  { %v3027_v55 = vadd.f32 %v3026_v53, %v5684_v29  ;;  %v3104_v58 = vadd.f32 %v3103_v54, %v5684_v29  ;;  %v3028_v59 = vpop.f32.mrb[55].mxu0  ;;  %v3105_v60 = vpop.f32.mrb[55].mxu1 }
 0x44e   :  { %v3029_v20 = vadd.f32 %v3028_v59, %v5684_v29  ;;  %v3106_v21 = vadd.f32 %v3105_v60, %v5684_v29 }
 0x44f   :  { %v3586_v8 = vmax.f32 %v3027_v55, 0.0  ;;  %v3588_v14 = vmax.f32 %v3104_v58, 0.0 }
 0x450   :  { %v3587_v15 = vmax.f32 %v3029_v20, 0.0  ;;  %v3589_v36 = vmax.f32 %v3106_v21, 0.0 }
 0x451   :  { %v4902_v17 = vpack.c.bf16 %v3586_v8, %v3570_v25  ;;  %v4906_v30 = vpack.c.bf16 %v3588_v14, %v3572_v28 }
 0x452   :  { %v4900_v33 = vpack.c.bf16 %v3587_v15, %v3571_v24  ;;  %v4904_v31 = vpack.c.bf16 %v3589_v36, %v3573_v26 }
 0x454   :  { %4901 = vmatprep.subr.bf16.mxu0 %v4900_v33  ;;  %4905 = vmatprep.subr.bf16.mxu1 %v4904_v31 }
 0x455   :  { %4903 = vmatpush1.bf16.msra.mxu0 %v4902_v17  ;;  %4907 = vmatpush1.bf16.msra.mxu1 %v4906_v30 }
 0x458   :  { %v3174_v32 = vpop.f32.mrb[56].mxu0  ;;  %v3251_v9 = vpop.f32.mrb[56].mxu1  ;;  %4380 = vmatmul.mubr.msk.f32.vlgmr.msra.gmra.mrb[68].mxu0 %vm2145_vm1, %v5697_v13  ;;  %4381 = vmatmul.mubr.msk.f32.vlgmr.msra.gmra.mrb[68].mxu1 %vm2145_vm1, %v5697_v13 }
 0x459   :  { %v3176_v42 = vpop.f32.mrb[57].mxu0  ;;  %v3253_v43 = vpop.f32.mrb[57].mxu1  ;;  %3822 = vmatprep.mubr.f32.mxu0 %v5771_v50  ;;  %3893 = vmatprep.mubr.f32.mxu1 %v5771_v50  ;;  %v3175_v37 = vadd.f32 %v3174_v32, %v5682_v2  ;;  %v3252_v1 = vadd.f32 %v3251_v9, %v5682_v2 }
 0x45a   :  { %v3177_v4 = vadd.f32 %v3176_v42, %v5682_v2  ;;  %v3254_v22 = vadd.f32 %v3253_v43, %v5682_v2 }
 0x45b   :  { %v3574_v49 = vmax.f32 %v3175_v37, 0.0  ;;  %v3576_v5 = vmax.f32 %v3252_v1, 0.0 }
 0x45c   :  { %v3180_v62 = vpop.f32.mrb[58].mxu0  ;;  %v3257_v27 = vpop.f32.mrb[58].mxu1  ;;  %v3575_v38 = vmax.f32 %v3177_v4, 0.0  ;;  %v3577_v39 = vmax.f32 %v3254_v22, 0.0 }
 0x45d   :  { %v3181_v56 = vadd.f32 %v3180_v62, %v5684_v29  ;;  %v3258_v61 = vadd.f32 %v3257_v27, %v5684_v29  ;;  %v3182_v18 = vpop.f32.mrb[59].mxu0  ;;  %v3259_v19 = vpop.f32.mrb[59].mxu1 }
 0x45e   :  { %v3183_v23 = vadd.f32 %v3182_v18, %v5684_v29  ;;  %v3260_v48 = vadd.f32 %v3259_v19, %v5684_v29 }
 0x45f   :  { %v3590_v16 = vmax.f32 %v3181_v56, 0.0  ;;  %v3592_v6 = vmax.f32 %v3258_v61, 0.0 }
 0x460   :  { %v3591_v10 = vmax.f32 %v3183_v23, 0.0  ;;  %v3593_v12 = vmax.f32 %v3260_v48, 0.0 }
 0x461   :  { %v4910_v40 = vpack.c.bf16 %v3590_v16, %v3574_v49  ;;  %v4914_v41 = vpack.c.bf16 %v3592_v6, %v3576_v5 }
 0x462   :  { %v4908_v63 = vpack.c.bf16 %v3591_v10, %v3575_v38  ;;  %v4912_v34 = vpack.c.bf16 %v3593_v12, %v3577_v39  ;;  %v3607_v12 = vpop.permute.xlu1 %3606 }
 0x464   :  { %4909 = vmatprep.subr.bf16.mxu0 %v4908_v63  ;;  %4913 = vmatprep.subr.bf16.mxu1 %v4912_v34 }
 0x465   :  { %4911 = vmatpush1.bf16.msra.mxu0 %v4910_v40  ;;  %4915 = vmatpush1.bf16.msra.mxu1 %v4914_v41 }
 0x468   :  { %v3328_v44 = vpop.f32.mrb[60].mxu0  ;;  %v3405_v45 = vpop.f32.mrb[60].mxu1  ;;  %4382 = vmatmul.mubr.msk.f32.vlgmr.msra.gmra.mrb[70].mxu0 %vm2145_vm1, %v5697_v13  ;;  %4383 = vmatmul.mubr.msk.f32.vlgmr.msra.gmra.mrb[70].mxu1 %vm2145_vm1, %v5697_v13 }
 0x469   :  { %v3330_v0 = vpop.f32.mrb[61].mxu0  ;;  %v3407_v7 = vpop.f32.mrb[61].mxu1  ;;  %3964 = vmatprep.mubr.f32.mxu0 %v5771_v50  ;;  %4035 = vmatprep.mubr.f32.mxu1 %v5771_v50  ;;  %v3329_v35 = vadd.f32 %v3328_v44, %v5682_v2  ;;  %v3406_v46 = vadd.f32 %v3405_v45, %v5682_v2 }
 0x46a   :  { %v3331_v47 = vadd.f32 %v3330_v0, %v5682_v2  ;;  %v3408_v3 = vadd.f32 %v3407_v7, %v5682_v2 }
 0x46b   :  { %v3578_v60 = vmax.f32 %v3329_v35, 0.0  ;;  %v3580_v20 = vmax.f32 %v3406_v46, 0.0 }
 0x46c   :  { %v3334_v51 = vpop.f32.mrb[62].mxu0  ;;  %v3411_v52 = vpop.f32.mrb[62].mxu1  ;;  %v3579_v28 = vmax.f32 %v3331_v47, 0.0  ;;  %v3581_v8 = vmax.f32 %v3408_v3, 0.0 }
 0x46d   :  { %v3335_v57 = vadd.f32 %v3334_v51, %v5684_v29  ;;  %v3412_v53 = vadd.f32 %v3411_v52, %v5684_v29  ;;  %v3336_v54 = vpop.f32.mrb[63].mxu0  ;;  %v3413_v55 = vpop.f32.mrb[63].mxu1 }
 0x46e   :  { %v3337_v58 = vadd.f32 %v3336_v54, %v5684_v29  ;;  %v3414_v59 = vadd.f32 %v3413_v55, %v5684_v29 }
 0x46f   :  { %v3594_v21 = vmax.f32 %v3335_v57, 0.0  ;;  %v3596_v25 = vmax.f32 %v3412_v53, 0.0 }
 0x470   :  { %v3595_v14 = vmax.f32 %v3337_v58, 0.0  ;;  %v3597_v24 = vmax.f32 %v3414_v59, 0.0 }
 0x471   :  { %v4918_v26 = vpack.c.bf16 %v3594_v21, %v3578_v60  ;;  %v4922_v15 = vpack.c.bf16 %v3596_v25, %v3580_v20 }
 0x472   :  { %v4916_v36 = vpack.c.bf16 %v3595_v14, %v3579_v28  ;;  %v4920_v17 = vpack.c.bf16 %v3597_v24, %v3581_v8 }
 0x474   :  { %4917 = vmatprep.subr.bf16.mxu0 %v4916_v36  ;;  %4921 = vmatprep.subr.bf16.mxu1 %v4920_v17 }
 0x475   :  { %4919 = vmatpush1.bf16.msra.mxu0 %v4918_v26  ;;  %4923 = vmatpush1.bf16.msra.mxu1 %v4922_v15 }
 0x478   :  { %v3482_v30 = vpop.f32.mrb[64].mxu0  ;;  %v3559_v33 = vpop.f32.mrb[64].mxu1  ;;  %4384 = vmatmul.mubr.msk.f32.vlgmr.msra.gmra.mrb[72].mxu0 %vm2145_vm1, %v5697_v13  ;;  %4385 = vmatmul.mubr.msk.f32.vlgmr.msra.gmra.mrb[72].mxu1 %vm2145_vm1, %v5697_v13 }
 0x479   :  { %v3484_v31 = vpop.f32.mrb[65].mxu0  ;;  %v3561_v32 = vpop.f32.mrb[65].mxu1  ;;  %4106 = vmatprep.mubr.f32.mxu0 %v5771_v50  ;;  %4177 = vmatprep.mubr.f32.mxu1 %v5771_v50  ;;  %v3483_v9 = vadd.f32 %v3482_v30, %v5682_v2  ;;  %v3560_v42 = vadd.f32 %v3559_v33, %v5682_v2 }
 0x47a   :  { %v3485_v43 = vadd.f32 %v3484_v31, %v5682_v2  ;;  %v3562_v37 = vadd.f32 %v3561_v32, %v5682_v2 }
 0x47b   :  { %v3582_v18 = vmax.f32 %v3483_v9, 0.0  ;;  %v3584_v19 = vmax.f32 %v3560_v42, 0.0 }
 0x47c   :  { %v3488_v1 = vpop.f32.mrb[66].mxu0  ;;  %v3565_v4 = vpop.f32.mrb[66].mxu1  ;;  %v3583_v49 = vmax.f32 %v3485_v43, 0.0  ;;  %v3585_v5 = vmax.f32 %v3562_v37, 0.0 }
 0x47d   :  { %v3489_v22 = vadd.f32 %v3488_v1, %v5684_v29  ;;  %v3566_v62 = vadd.f32 %v3565_v4, %v5684_v29  ;;  %v3490_v27 = vpop.f32.mrb[67].mxu0  ;;  %v3567_v56 = vpop.f32.mrb[67].mxu1 }
 0x47e   :  { %v3491_v61 = vadd.f32 %v3490_v27, %v5684_v29  ;;  %v3568_v50 = vadd.f32 %v3567_v56, %v5684_v29  ;;  %v3611_v29 = vsub.s32 0, %v5248_v11 }
 0x47f   :  { %v3598_v23 = vmax.f32 %v3489_v22, 0.0  ;;  %v3600_v48 = vmax.f32 %v3566_v62, 0.0 }
 0x480   :  { %v3599_v16 = vmax.f32 %v3491_v61, 0.0  ;;  %v3601_v2 = vmax.f32 %v3568_v50, 0.0  ;;  %v3612_v40 = vrot.slane %v3607_v12, %v3611_v29 }
 0x481   :  { %v4926_v6 = vpack.c.bf16 %v3598_v23, %v3582_v18  ;;  %v4930_v38 = vpack.c.bf16 %v3600_v48, %v3584_v19 }
 0x482   :  { %v4924_v39 = vpack.c.bf16 %v3599_v16, %v3583_v49  ;;  %v4928_v10 = vpack.c.bf16 %v3601_v2, %v3585_v5 }
 0x484   :  { %4925 = vmatprep.subr.bf16.mxu0 %v4924_v39  ;;  %4929 = vmatprep.subr.bf16.mxu1 %v4928_v10 }
 0x485   :  { %4927 = vmatpush1.bf16.msra.mxu0 %v4926_v6  ;;  %4931 = vmatpush1.bf16.msra.mxu1 %v4930_v38 }
 0x488   :  { %4386 = vmatmul.mubr.msk.f32.vlgmr.msra.gmra.mrb[74].mxu0 %vm2145_vm1, %v5697_v13  ;;  %4387 = vmatmul.mubr.msk.f32.vlgmr.msra.gmra.mrb[74].mxu1 %vm2145_vm1, %v5697_v13 }
 0x52b   :  { %v3682_v41 = vpop.f32.mrb[68].mxu0  ;;  %v3753_v63 = vpop.f32.mrb[68].mxu1 }
 0x52c   :  { %v3683_v34 = vadd.f32 %v3682_v41, %v3612_v40  ;;  %v3754_v44 = vadd.f32 %v3753_v63, %v3612_v40  ;;  %v3684_v45 = vpop.f32.mrb[69].mxu0  ;;  %v3755_v0 = vpop.f32.mrb[69].mxu1 }
 0x52d   :  { %v3685_v7 = vadd.f32 %v3684_v45, %v3612_v40  ;;  %v3756_v35 = vadd.f32 %v3755_v0, %v3612_v40 }
 0x52e   :  { %4185 = vst [vmem:[#allocation7] ss:$16 sm:$0x1] %v3683_v34  ;;  %4197 = vst [vmem:[#allocation7 + $0x2] ss:$16 sm:$0x1] %v3754_v44 }
 0x52f   :  { %4191 = vst [vmem:[#allocation7 + $0x1] ss:$16 sm:$0x1] %v3685_v7  ;;  %4203 = vst [vmem:[#allocation7 + $0x3] ss:$16 sm:$0x1] %v3756_v35 }
 0x53b   :  { %v3824_v46 = vpop.f32.mrb[70].mxu0  ;;  %v3895_v47 = vpop.f32.mrb[70].mxu1 }
 0x53c   :  { %v3825_v3 = vadd.f32 %v3824_v46, %v3612_v40  ;;  %v3896_v13 = vadd.f32 %v3895_v47, %v3612_v40  ;;  %v3826_v51 = vpop.f32.mrb[71].mxu0  ;;  %v3897_v11 = vpop.f32.mrb[71].mxu1 }
 0x53d   :  { %v3827_v52 = vadd.f32 %v3826_v51, %v3612_v40  ;;  %v3898_v57 = vadd.f32 %v3897_v11, %v3612_v40 }
 0x53e   :  { %4209 = vst [vmem:[#allocation7 + $0x4] ss:$16 sm:$0x1] %v3825_v3  ;;  %4221 = vst [vmem:[#allocation7 + $0x6] ss:$16 sm:$0x1] %v3896_v13 }
 0x53f   :  { %4215 = vst [vmem:[#allocation7 + $0x5] ss:$16 sm:$0x1] %v3827_v52  ;;  %4227 = vst [vmem:[#allocation7 + $0x7] ss:$16 sm:$0x1] %v3898_v57 }
 0x54b   :  { %v3966_v53 = vpop.f32.mrb[72].mxu0  ;;  %v4037_v54 = vpop.f32.mrb[72].mxu1 }
 0x54c   :  { %v3967_v55 = vadd.f32 %v3966_v53, %v3612_v40  ;;  %v4038_v58 = vadd.f32 %v4037_v54, %v3612_v40  ;;  %v3968_v59 = vpop.f32.mrb[73].mxu0  ;;  %v4039_v60 = vpop.f32.mrb[73].mxu1 }
 0x54d   :  { %v3969_v20 = vadd.f32 %v3968_v59, %v3612_v40  ;;  %v4040_v21 = vadd.f32 %v4039_v60, %v3612_v40 }
 0x54e   :  { %4233 = vst [vmem:[#allocation7 + $0x8] ss:$16 sm:$0x1] %v3967_v55  ;;  %4245 = vst [vmem:[#allocation7 + $0xa] ss:$16 sm:$0x1] %v4038_v58 }
 0x54f   :  { %4239 = vst [vmem:[#allocation7 + $0x9] ss:$16 sm:$0x1] %v3969_v20  ;;  %4251 = vst [vmem:[#allocation7 + $0xb] ss:$16 sm:$0x1] %v4040_v21 }
 0x55b   :  { %v4108_v25 = vpop.f32.mrb[74].mxu0  ;;  %v4179_v28 = vpop.f32.mrb[74].mxu1 }
 0x55c   :  { %v4109_v8 = vadd.f32 %v4108_v25, %v3612_v40  ;;  %v4180_v14 = vadd.f32 %v4179_v28, %v3612_v40  ;;  %v4110_v24 = vpop.f32.mrb[75].mxu0  ;;  %v4181_v26 = vpop.f32.mrb[75].mxu1 }
 0x55d   :  { %v4111_v15 = vadd.f32 %v4110_v24, %v3612_v40  ;;  %v4182_v36 = vadd.f32 %v4181_v26, %v3612_v40 }
 0x55e   :  { %4257 = vst [vmem:[#allocation7 + $0xc] ss:$16 sm:$0x1] %v4109_v8  ;;  %4269 = vst [vmem:[#allocation7 + $0xe] ss:$16 sm:$0x1] %v4180_v14 }
 0x55f   :  { %4263 = vst [vmem:[#allocation7 + $0xd] ss:$16 sm:$0x1] %v4111_v15  ;;  %4275 = vst [vmem:[#allocation7 + $0xf] ss:$16 sm:$0x1] %v4182_v36 }
 0x560   :  { %4979 = shalt.err (!%p4976_p12)
}
 0x561   :  { %s4980_s15 = scalar_lea.hbm %s5767_s9, 256 }
 0x562   :  { %p4981_p13 = scmp.ne.s32.totalorder %s5767_s9, %s4980_s15  ;;  %p4984_p0 = scmp.lt.u32.totalorder %s4980_s15, %s5767_s9 }
 0x564   :  { %p4986_p1 = pnand %p4984_p0, %p4981_p13 }
 0x566   :  { %4989 = shalt.err (!%p4986_p1)
}
 0x567   :  { %s5004_s8 = smov 128   ;;  %s5005_s20 = smov 8  }
 0x568   :  { %4290 = dma.vmem_to_hbm [thread:$0]  %s4285_s0, 256, %s5767_s9, [#allocation6], %s5004_s8, %s5004_s8, %s5005_s20  }
 0x569   :  { %4992 = dma.done.wait [#allocation6], 256  }
 0x56a   :  { %4993 = vsyncadd [#allocation6], 4294967040 }
 0x56b   :  { %4294 = vsyncpa [#allocation5], 1 }
 0x56c   :  { %4295 = vsyncpa [#allocation6], 1 }

</bundles_post_ra>
